<compile_context>
chip_gen: v7x
topology: tpu7x:2x2x1
jax: 0.10.0
libtpu: 0.0.40
codegen_flags: <defaults>
</compile_context>

<pallas_src>
import functools

import jax
import jax.numpy as jnp
from jax.experimental import pallas as pl
from jax.experimental.pallas import tpu as pltpu

_LN_EPS = 1e-5  # PyTorch nn.LayerNorm default


def _resblock_kernel(has_skip, dim_out, x_ref, w_ref, p_ref, o_ref):
    """x_ref: (TM, dim_in); w_ref: (dim_in, dim_out or 2*dim_out) bf16;
    p_ref: (3, dim_out) f32 rows = [bias, gamma, beta]; o_ref: (TM, dim_out)."""
    x = x_ref[...]

    # Single fused MXU matmul: bf16 operands, f32 accumulation.
    # Produces [dense | skip] when a skip projection exists.
    hw = jnp.dot(x.astype(w_ref.dtype), w_ref[...],
                 preferred_element_type=jnp.float32)

    h = hw[:, :dim_out] + p_ref[0:1, :]            # + bias

    # LayerNorm over the feature (lane) axis, f32 epilogue.
    mean = jnp.mean(h, axis=-1, keepdims=True)
    centered = h - mean
    var = jnp.mean(centered * centered, axis=-1, keepdims=True)
    h_norm = centered * jax.lax.rsqrt(var + _LN_EPS)
    h_norm = h_norm * p_ref[1:2, :] + p_ref[2:3, :]  # * gamma + beta

    if has_skip:
        identity = hw[:, dim_out:]                  # skip projection (fused dot)
    else:
        identity = x.astype(jnp.float32)            # identity skip (dim_in == dim_out)

    out = h_norm + identity
    # SiLU: x * sigmoid(x)  (sigmoid -> EUP slot, effectively free vs MXU)
    o_ref[...] = (out * jax.nn.sigmoid(out)).astype(o_ref.dtype)


def resblock_pallas(x, w_dense, b_dense, ln_gamma, ln_beta, w_skip=None,
                    *, tm=256, matmul_dtype=jnp.bfloat16):
    """x: (N, dim_in); w_dense: (dim_in, dim_out); b_dense/ln_*: (dim_out,);
    w_skip: (dim_in, dim_out) or None. Returns (N, dim_out) in x.dtype."""
    n, dim_in = x.shape
    dim_out = w_dense.shape[1]
    has_skip = w_skip is not None
    if not has_skip:
        assert dim_in == dim_out, (
            "identity skip requires dim_in == dim_out; pass w_skip otherwise")

    # Pack matmul weights once on the host (bf16 halves VMEM + HBM traffic).
    if has_skip:
        w_packed = jnp.concatenate([w_dense, w_skip], axis=1).astype(matmul_dtype)
    else:
        w_packed = w_dense.astype(matmul_dtype)
    w_cols = w_packed.shape[1]

    # Pack bias / gamma / beta into one (3, dim_out) f32 array.
    params = jnp.stack(
        [b_dense.astype(jnp.float32),
         ln_gamma.astype(jnp.float32),
         ln_beta.astype(jnp.float32)], axis=0)

    tm = min(tm, n)                      # row tile (full array if N is small)
    grid = (pl.cdiv(n, tm),)

    return pl.pallas_call(
        functools.partial(_resblock_kernel, has_skip, dim_out),
        out_shape=jax.ShapeDtypeStruct((n, dim_out), x.dtype),
        grid=grid,
        in_specs=[
            pl.BlockSpec((tm, dim_in), lambda i: (i, 0)),       # x: row-tiled
            pl.BlockSpec((dim_in, w_cols), lambda i: (0, 0)),   # weights: resident
            pl.BlockSpec((3, dim_out), lambda i: (0, 0)),       # bias/gamma/beta
        ],
        out_specs=pl.BlockSpec((tm, dim_out), lambda i: (i, 0)),
        compiler_params=pltpu.CompilerParams(
            dimension_semantics=("parallel",)),  # v7x: shard rows across 2 TCs
    )(x, w_packed, params)
    # TODO(synk): for dim_in*dim_out large enough that resident bf16 weights
    # exceed v7x's 64 MiB VMEM, add a K-tiling grid axis with an f32 accumulator.


def resblock_ref(x, w_dense, b_dense, ln_gamma, ln_beta, w_skip=None,
                 matmul_dtype=jnp.bfloat16):
    """Pure-JAX reference matching the PyTorch module, mirroring the kernel's
    bf16-operand / f32-accumulation matmuls."""
    xm = x.astype(matmul_dtype)
    h = jnp.dot(xm, w_dense.astype(matmul_dtype),
                preferred_element_type=jnp.float32) + b_dense
    mean = jnp.mean(h, axis=-1, keepdims=True)
    var = jnp.mean((h - mean) ** 2, axis=-1, keepdims=True)
    h = (h - mean) * jax.lax.rsqrt(var + _LN_EPS) * ln_gamma + ln_beta
    if w_skip is None:
        identity = x
    else:
        identity = jnp.dot(xm, w_skip.astype(matmul_dtype),
                           preferred_element_type=jnp.float32)
    out = h + identity
    return out * jax.nn.sigmoid(out)


def _init_params(key, dim_in, dim_out, has_skip):
    ks = jax.random.split(key, 3)
    bound = 1.0 / jnp.sqrt(dim_in)   # roughly PyTorch nn.Linear init scale
    w_dense = jax.random.uniform(ks[0], (dim_in, dim_out), jnp.float32, -bound, bound)
    b_dense = jax.random.uniform(ks[1], (dim_out,), jnp.float32, -bound, bound)
    ln_gamma = jnp.ones((dim_out,), jnp.float32)
    ln_beta = jnp.zeros((dim_out,), jnp.float32)
    w_skip = None
    if has_skip:
        w_skip = jax.random.uniform(ks[2], (dim_in, dim_out), jnp.float32, -bound, bound)
    return w_dense, b_dense, ln_gamma, ln_beta, w_skip


if __name__ == "__main__":
    key = jax.random.PRNGKey(0)
    kx1, kx2, kp1, kp2 = jax.random.split(key, 4)

    # Case 1: dim_in != dim_out -> skip projection active (lane-dense dims,
    # N > TM so the row grid / pipelining actually runs more than one step).
    n, dim_in, dim_out = 512, 128, 256
    x1 = jax.random.normal(kx1, (n, dim_in), jnp.float32)
    p1 = _init_params(kp1, dim_in, dim_out, has_skip=True)
    out1 = jax.block_until_ready(resblock_pallas(x1, *p1))
    ref1 = resblock_ref(x1, *p1)
    assert out1.shape == (n, dim_out)
    assert jnp.allclose(out1, ref1, atol=2e-3, rtol=2e-3), "skip-case mismatch"

    # Case 2: dim_in == dim_out -> identity skip
    dim = 128
    x2 = jax.random.normal(kx2, (n, dim), jnp.float32)
    p2 = _init_params(kp2, dim, dim, has_skip=False)
    out2 = jax.block_until_ready(resblock_pallas(x2, *p2))
    ref2 = resblock_ref(x2, *p2)
    assert out2.shape == (n, dim)
    assert jnp.allclose(out2, ref2, atol=2e-3, rtol=2e-3), "identity-case mismatch"

    print("KERNEL_OK")
</pallas_src>

<mosaic_0001>
module attributes {stable_mosaic.version = 11 : i64} {
  func.func @_resblock_kernel(%arg0: i32, %arg1: memref<256x128xf32, #tpu.memory_space<vmem>>, %arg2: memref<128x512xbf16, #tpu.memory_space<vmem>>, %arg3: memref<3x256xf32, #tpu.memory_space<vmem>>, %arg4: memref<256x256xf32, #tpu.memory_space<vmem>>) attributes {dimension_semantics = [#tpu.dimension_semantics<parallel>], iteration_bounds = array<i64: 2>, scalar_prefetch = 0 : i64, scratch_operands = 0 : i64, tpu.core_type = #tpu.core_type<tc>, window_params = [{transform_indices = @transform_0, window_bounds = array<i64: 256, 128>}, {pipeline_mode = #tpu.pipeline_mode<synchronous>, transform_indices = @transform_1, window_bounds = array<i64: 128, 512>}, {pipeline_mode = #tpu.pipeline_mode<synchronous>, transform_indices = @transform_2, window_bounds = array<i64: 3, 256>}, {transform_indices = @transform_3, window_bounds = array<i64: 256, 256>}]} {
    %c0 = arith.constant 0 : index
    %c0_0 = arith.constant 0 : index
    %0 = vector.load %arg1[%c0, %c0_0] : memref<256x128xf32, #tpu.memory_space<vmem>>, vector<256x128xf32>
    %1 = arith.truncf %0 : vector<256x128xf32> to vector<256x128xbf16>
    %c0_1 = arith.constant 0 : index
    %c0_2 = arith.constant 0 : index
    %2 = vector.load %arg2[%c0_1, %c0_2] : memref<128x512xbf16, #tpu.memory_space<vmem>>, vector<128x512xbf16>
    %cst = arith.constant dense<0.000000e+00> : vector<256x512xf32>
    %3 = tpu.matmul %1, %2, %cst {dimension_numbers = #tpu.dot_dimension_numbers<[1], [0], [0], [1], [0, 0, 1, 1], [], []>} : vector<256x128xbf16>, vector<128x512xbf16>, vector<256x512xf32> -> vector<256x512xf32>
    %4 = vector.extract_strided_slice %3 {offsets = [0, 0], sizes = [256, 256], strides = [1, 1]} : vector<256x512xf32> to vector<256x256xf32>
    %c0_3 = arith.constant 0 : index
    %c0_4 = arith.constant 0 : index
    %5 = vector.load %arg3[%c0_3, %c0_4] : memref<3x256xf32, #tpu.memory_space<vmem>>, vector<1x256xf32>
    %6 = vector.broadcast %5 : vector<1x256xf32> to vector<256x256xf32>
    %7 = arith.addf %4, %6 : vector<256x256xf32>
    %cst_5 = arith.constant dense<0.000000e+00> : vector<256xf32>
    %8 = vector.multi_reduction <add>, %7, %cst_5 [1] : vector<256x256xf32> to vector<256xf32>
    %9 = vector.shape_cast %8 : vector<256xf32> to vector<256x1xf32>
    %cst_6 = arith.constant 2.560000e+02 : f32
    %10 = vector.broadcast %cst_6 : f32 to vector<256x1xf32>
    %11 = arith.divf %9, %10 : vector<256x1xf32>
    %12 = vector.broadcast %11 : vector<256x1xf32> to vector<256x256xf32>
    %13 = arith.subf %7, %12 : vector<256x256xf32>
    %14 = arith.mulf %13, %13 : vector<256x256xf32>
    %cst_7 = arith.constant dense<0.000000e+00> : vector<256xf32>
    %15 = vector.multi_reduction <add>, %14, %cst_7 [1] : vector<256x256xf32> to vector<256xf32>
    %16 = vector.shape_cast %15 : vector<256xf32> to vector<256x1xf32>
    %cst_8 = arith.constant 2.560000e+02 : f32
    %17 = vector.broadcast %cst_8 : f32 to vector<256x1xf32>
    %18 = arith.divf %16, %17 : vector<256x1xf32>
    %cst_9 = arith.constant 9.99999974E-6 : f32
    %19 = vector.broadcast %cst_9 : f32 to vector<256x1xf32>
    %20 = arith.addf %18, %19 : vector<256x1xf32>
    %21 = math.rsqrt %20 : vector<256x1xf32>
    %22 = vector.broadcast %21 : vector<256x1xf32> to vector<256x256xf32>
    %23 = arith.mulf %13, %22 : vector<256x256xf32>
    %c1 = arith.constant 1 : index
    %c0_10 = arith.constant 0 : index
    %24 = vector.load %arg3[%c1, %c0_10] : memref<3x256xf32, #tpu.memory_space<vmem>>, vector<1x256xf32>
    %25 = vector.broadcast %24 : vector<1x256xf32> to vector<256x256xf32>
    %26 = arith.mulf %23, %25 : vector<256x256xf32>
    %c2 = arith.constant 2 : index
    %c0_11 = arith.constant 0 : index
    %27 = vector.load %arg3[%c2, %c0_11] : memref<3x256xf32, #tpu.memory_space<vmem>>, vector<1x256xf32>
    %28 = vector.broadcast %27 : vector<1x256xf32> to vector<256x256xf32>
    %29 = arith.addf %26, %28 : vector<256x256xf32>
    %30 = vector.extract_strided_slice %3 {offsets = [0, 256], sizes = [256, 256], strides = [1, 1]} : vector<256x512xf32> to vector<256x256xf32>
    %31 = arith.addf %29, %30 : vector<256x256xf32>
    %32 = arith.negf %31 : vector<256x256xf32>
    %33 = math.exp %32 : vector<256x256xf32>
    %cst_12 = arith.constant 1.000000e+00 : f32
    %34 = vector.broadcast %cst_12 : f32 to vector<256x256xf32>
    %35 = arith.addf %34, %33 : vector<256x256xf32>
    %36 = arith.divf %34, %35 : vector<256x256xf32>
    %37 = arith.mulf %31, %36 : vector<256x256xf32>
    %c0_13 = arith.constant 0 : index
    %c0_14 = arith.constant 0 : index
    %38 = vector.load %arg4[%c0_13, %c0_14] : memref<256x256xf32, #tpu.memory_space<vmem>>, vector<256x256xf32>
    tpu.vector_store %arg4[%c0_13, %c0_14], %37 {strides = array<i32>} : memref<256x256xf32, #tpu.memory_space<vmem>>, vector<256x256xf32>,
    return
  }
  func.func @transform_0(%arg0: i32) -> (i32, i32) {
    %c0_i32 = arith.constant 0 : i32
    %c0_i32_0 = arith.constant 0 : i32
    return %arg0, %c0_i32 : i32, i32
  }
  func.func @transform_1(%arg0: i32) -> (i32, i32) {
    %c0_i32 = arith.constant 0 : i32
    %c0_i32_0 = arith.constant 0 : i32
    %c0_i32_1 = arith.constant 0 : i32
    return %c0_i32, %c0_i32_0 : i32, i32
  }
  func.func @transform_2(%arg0: i32) -> (i32, i32) {
    %c0_i32 = arith.constant 0 : i32
    %c0_i32_0 = arith.constant 0 : i32
    %c0_i32_1 = arith.constant 0 : i32
    return %c0_i32, %c0_i32_0 : i32, i32
  }
  func.func @transform_3(%arg0: i32) -> (i32, i32) {
    %c0_i32 = arith.constant 0 : i32
    %c0_i32_0 = arith.constant 0 : i32
    return %arg0, %c0_i32 : i32, i32
  }
}

</mosaic_0001>

<bundles_post_ra>
// kernel: tpu_custom_call.1
= control target key start
LH: loop header
LB: loop body
LE: loop exit
PB: predicated region body
PF: predicated region fallthrough
CT: control target
= control target key end

     0   :  { %8 = vsyncpa [#allocation3], 0  ;;  %s4692_s0 = inlined_call_operand.hbm [shape: f32[512,128], index: 0, kind: input, shape index: {}]   ;;  %s4693_s1 = inlined_call_operand.hbm [shape: bf16[128,512], index: 1, kind: input, shape index: {}]   ;;  %s4694_s2 = inlined_call_operand.hbm [shape: f32[3,256], index: 2, kind: input, shape index: {}]   ;;  %s4695_s3 = inlined_call_operand.hbm [shape: f32[512,256], index: 3, kind: output, shape index: {}]  }
   0x1   :  { %10 = vsyncpa [#allocation3 + $0x1], 0 }
   0x2   :  { %11 = vsyncpa [#allocation6], 0 }
   0x3   :  { %12 = vsyncpa [#allocation4], 0 }
   0x4   :  { %14 = vsyncpa [#allocation4 + $0x1], 0  ;;  %s3020_s12 = smov 0   ;;  %s3022_s13 = smov 0  }
   0x5   :  { %s3024_s14 = smov 0   ;;  %s3026_s15 = smov 0  }
   0x6 LB: > { %s3041_s16 = sadd.s32 4294967295, %s2987_s15   ;;  %s2271_s17 = sadd.s32 4294967294, %s2987_s15   ;;  %s2987_s15 = sphi %s3026_s15, %s4955_s15   ;;  %s2983_s14 = sphi %s3024_s14, %s4954_s14   ;;  %s2979_s13 = sphi %s3022_s13, %s4953_s13   ;;  %s2975_s12 = sphi %s3020_s12, %s4952_s12  }
   0x7   : > { %p40_p0 = scmp.ne.s32.totalorder %s2979_s13, %s2975_s12  ;;  %p4696_p1 = scmp.eq.s32.totalorder %s3041_s16, 0 }
   0x8   : > { %p112_p3 = scmp.eq.s32.totalorder %s2271_s17, 1  ;;  %p2272_p5 = scmp.ge.s32.totalorder %s2987_s15, 1 }
   0x9   : > { %p3050_p4 = por %p4696_p1, %p40_p0  ;;  %p119_p7 = scmp.lt.s32.totalorder %s2987_s15, 3 }
   0xa   : > { %p3055_p6 = por %p112_p3, %p40_p0  ;;  %s2989_s21 = smov [#allocation5]  }
   0xb   : > { %s4761_s18 = scalar_select %p3050_p4, 1, 0 }
   0xc   : > { %s4762_s19 = scalar_select %p3055_p6, 1, 0 }
   0xd   : > { %p3060_p8 = pnand %p2272_p5, %p119_p7  ;;  %s131_s22 = sshll.u32 %s2989_s21, 4  ;;  %s3064_s22 = int_to_ptr.vmem [resolvable:$true] %s131_s22 }
   0xe   : > { %s2990_s24 = smov [#allocation7]   ;;  %s2831_s28 = scalar_lea.hbm %s4693_s1, 4096 }
   0xf   : > { %p2401_p9 = pneg %p3060_p8  ;;  %s145_s25 = sshll.u32 %s2990_s24, 4  ;;  %s3075_s25 = int_to_ptr.vmem [resolvable:$true] %s145_s25 }
  0x10   : > { %p2832_p12 = scmp.ne.s32.totalorder %s4693_s1, %s2831_s28  ;;  %p2838_p5 = scmp.lt.u32.totalorder %s2831_s28, %s4693_s1 }
  0x11   : > { %p3071_p11 = pnand %p2401_p9, %p4696_p1 }
  0x13   : > { %p2833_p13 = pneg %p3071_p11 }
  0x15   : > { %p2834_p0 = pnand %p2833_p13, %p2832_p12 }
  0x17   : > { %p2835_p3 = pneg %p2834_p0 }
  0x19   : > { %p2840_p7 = pnand %p2838_p5, %p2835_p3 }
  0x1b   : > { %2843 = shalt.err (!%p2840_p7)
}
  0x1c   : > { %s2844_s6 = scalar_lea.vmem %s3064_s22, 4096  ;;  %p2852_p2 = scmp.lt.s32.totalorder %s3064_s22, %s3064_s22 }
  0x1d   : > { %p2845_p9 = scmp.ne.s32.totalorder %s3064_s22, %s2844_s6  ;;  %p2853_p12 = scmp.lt.s32.totalorder %s2844_s6, %s2844_s6 }
  0x1f   : > { %p2847_p10 = pnand %p2845_p9, %p2833_p13  ;;  %p2854_p0 = por %p2853_p12, %p2852_p2 }
  0x21   : > { %p2848_p1 = pneg %p2847_p10 }
  0x23   : > { %p2855_p6 = pnand %p2854_p0, %p2848_p1 }
  0x25   : > { %2858 = shalt.err (!%p2855_p6)
}
  0x26   : > { %s2991_s7 = smov 256   ;;  %s2992_s8 = smov 16  }
  0x27   : > { %2404 = dma.hbm_to_vmem [thread:$0]  (!%p3071_p11), %s4693_s1, 4096, %s3064_s22, [#allocation6], %s2991_s7, %s2991_s7, %s2992_s8  }
  0x28   : > { %s2859_s21 = scalar_lea.hbm %s4694_s2, 128 }
  0x29   : > { %p2860_p2 = scmp.ne.s32.totalorder %s4694_s2, %s2859_s21  ;;  %p2866_p10 = scmp.lt.u32.totalorder %s2859_s21, %s4694_s2 }
  0x2b   : > { %p2862_p1 = pnand %p2860_p2, %p2833_p13 }
  0x2d   : > { %p2863_p6 = pneg %p2862_p1 }
  0x2f   : > { %p2868_p3 = pnand %p2866_p10, %p2863_p6 }
  0x31   : > { %2871 = shalt.err (!%p2868_p3)
}
  0x32   : > { %s2872_s22 = scalar_lea.vmem %s3075_s25, 128  ;;  %p2880_p12 = scmp.lt.s32.totalorder %s3075_s25, %s3075_s25 }
  0x33   : > { %p2873_p5 = scmp.ne.s32.totalorder %s3075_s25, %s2872_s22  ;;  %p2881_p0 = scmp.lt.s32.totalorder %s2872_s22, %s2872_s22 }
  0x35   : > { %p2875_p7 = pnand %p2873_p5, %p2833_p13  ;;  %p2882_p2 = por %p2881_p0, %p2880_p12 }
  0x37   : > { %p2876_p9 = pneg %p2875_p7 }
  0x39   : > { %p2883_p1 = pnand %p2882_p2, %p2876_p9 }
  0x3b   : > { %2886 = shalt.err (!%p2883_p1)
}
  0x3c   : > { %2407 = dma.hbm_to_vmem [thread:$0]  (!%p3071_p11), %s4694_s2, 128, %s3075_s25, [#allocation6]  }
  0x3d   : > { %s3130_s4 = sadd.s32 1, %s2987_s15   ;;  %s27_s23 = sadd.s32 1, %s2983_s14 }
  0x3e   : > { %s24_s5 = ssub.s32 %s2987_s15, %s3130_s4  ;;  %p34_p13 = scmp.ne.s32.totalorder %s2983_s14, %s2979_s13 }
  0x3f   : > { %p25_p6 = scmp.eq.s32.totalorder %s24_s5, 0  ;;  %p35_p10 = scmp.eq.s32.totalorder %s2987_s15, 0 }
  0x40   : > { %p4765_p3 = scmp.eq.s32.totalorder %s3041_s16, 1  ;;  %p2418_p7 = scmp.lt.s32.totalorder %s2987_s15, 2 }
  0x41   : > { %s3146_s7 = scalar_select %p25_p6, %s2983_s14, %s27_s23  }
  0x42   : > { %p3140_p5 = por %p4765_p3, %p34_p13  ;;  %p36_p9 = por %p35_p10, %p34_p13 }
  0x43   : > { %s156_s8 = sand.u32 1, %s2983_s14   ;;  %s2386_s25 = sshll.u32 %s2987_s15, 12 }
  0x44   : > { %s4766_s6 = scalar_select %p3140_p5, 1, 0 }
  0x45   : > { %s2276_s9 = sshll.u32 %s156_s8, 8  ;;  %s3153_s17 = scalar_lea.hbm %s4692_s0, %s2386_s25 }
  0x46   : > { %s160_s21 = scalar_lea.vmem [#allocation2], %s2276_s9  ;;  %p3157_p11 = pnand %p2418_p7, %p36_p9 }
  0x47   : > { %s167_s24 = sshll.u32 %s160_s21, 4  ;;  %s3161_s27 = scalar_lea.sflag [#allocation3], %s156_s8  ;;  %s3155_s24 = int_to_ptr.vmem [resolvable:$true] %s167_s24 }
  0x48   : > { %s2887_s28 = scalar_lea.hbm %s3153_s17, 4096  ;;  %p2889_p0 = pneg %p3157_p11 }
  0x49   : > { %p2888_p12 = scmp.ne.s32.totalorder %s3153_s17, %s2887_s28  ;;  %s2892_s30 = scalar_lea.hbm %s4692_s0, 8192 }
  0x4a   : > { %p2893_p13 = scmp.lt.u32.totalorder %s3153_s17, %s4692_s0  ;;  %p2894_p6 = scmp.lt.u32.totalorder %s2892_s30, %s2887_s28 }
  0x4b   : > { %p2890_p2 = pnand %p2889_p0, %p2888_p12  ;;  %p2896_p3 = scmp.lt.u32.totalorder %s2887_s28, %s3153_s17 }
  0x4c   : > { %p2895_p10 = por %p2894_p6, %p2893_p13 }
  0x4d   : > { %p2891_p1 = pneg %p2890_p2 }
  0x4e   : > { %p2897_p7 = por %p2896_p3, %p2895_p10 }
  0x50   : > { %p2898_p9 = pnand %p2897_p7, %p2891_p1 }
  0x52   : > { %2901 = shalt.err (!%p2898_p9)
}
  0x53   : > { %s2902_s8 = scalar_lea.vmem %s3155_s24, 4096  ;;  %s2993_s9 = smov [#allocation2]  }
  0x54   : > { %p2903_p12 = scmp.ne.s32.totalorder %s3155_s24, %s2902_s8  ;;  %s2907_s25 = sshll.u32 %s2993_s9, 4  ;;  %s2908_s25 = int_to_ptr.vmem [resolvable:$false] %s2907_s25 }
  0x55   : > { %s2909_s10 = scalar_lea.vmem %s2908_s25, 8192  ;;  %p2910_p4 = scmp.lt.s32.totalorder %s3155_s24, %s2908_s25 }
  0x56   : > { %p2905_p2 = pnand %p2903_p12, %p2889_p0  ;;  %p2911_p13 = scmp.lt.s32.totalorder %s2909_s10, %s2902_s8 }
  0x58   : > { %p2906_p5 = pneg %p2905_p2  ;;  %p2912_p6 = por %p2911_p13, %p2910_p4 }
  0x5a   : > { %p2913_p10 = pnand %p2912_p6, %p2906_p5 }
  0x5c   : > { %2916 = shalt.err (!%p2913_p10)
}
  0x5d   : > { %s2994_s11 = smov 128   ;;  %s2995_s21 = smov 8  }
  0x5e   : > { %2411 = dma.hbm_to_vmem [thread:$0]  (!%p3157_p11), %s3153_s17, 4096, %s3155_s24, %s3161_s27, %s2994_s11, %s2994_s11, %s2995_s21  }
  0x5f   : > { %179 = sbr.rel (%p3060_p8) target bundleno = 875 (0x36b), region = 32 }
  0x66   : > { %s3192_s28 = sand.u32 1, %s2979_s13   ;;  %p4768_p4 = scmp.ne.s32.totalorder %s4761_s18, 0 }
  0x67   : > { %s2280_s22 = sshll.u32 %s3192_s28, 8  ;;  %s182_s29 = scalar_lea.sflag [#allocation3], %s3192_s28 }
  0x68   : > { %s3196_s30 = scalar_lea.vmem [#allocation2], %s2280_s22 }
  0x69   : > { %2962 = dma.done.wait (%p4768_p4), %s182_s29, 4096  }
  0x6a   : > { %2964 = vsyncadd (%p4768_p4), %s182_s29, 4294963200  ;;  %p4769_p5 = scmp.eq.s32.totalorder %s3041_s16, 0 }
  0x6c   : > { %2966 = dma.done.wait (%p4769_p5), [#allocation6], 4224   ;;  %p4770_p8 = pmov %p4769_p5 }
  0x6d   : > { %v2996_v0 = vmov 0   ;;  %v2463_v1 = vld [vmem:[#allocation5 + $0x4] ss:$16 sps:$4 sm:$0xff]   ;;  %v2465_v2 = vld [vmem:[#allocation5] ss:$16 sps:$4 sm:$0xff]   ;;  %v220_v18 = vld [vmem:[%s3196_s30 + $0x8] sm:$0xff] }
  0x6e   : > { %2968 = vsyncadd (%p4770_p8), [#allocation6], 4294963072  ;;  %491 = vmatprep.mubr.bf16.mxu0 %v2996_v0  ;;  %684 = vmatprep.mubr.bf16.mxu1 %v2996_v0  ;;  %v2466_v3 = vld [vmem:[#allocation5 + $0x24] ss:$16 sps:$4 sm:$0xff]   ;;  %v2468_v4 = vld [vmem:[#allocation5 + $0x20] ss:$16 sps:$4 sm:$0xff]  }
  0x6f   : > { %459 = vmatprep.subr.bf16.mxu0 %v2463_v1  ;;  %v2469_v5 = vld [vmem:[#allocation5 + $0x44] ss:$16 sps:$4 sm:$0xff]   ;;  %v2471_v6 = vld [vmem:[#allocation5 + $0x40] ss:$16 sps:$4 sm:$0xff]   ;;  %v222_v21 = vld [vmem:[%s3196_s30 + $0x18] sm:$0xff]  ;;  %s2283_s18 = sshll.u32 %s3192_s28, 9 }
  0x70   : > { %460 = vmatpush1.bf16.msra.mxu0 %v2465_v2  ;;  %v2472_v7 = vld [vmem:[#allocation5 + $0x64] ss:$16 sps:$4 sm:$0xff]   ;;  %v2474_v8 = vld [vmem:[#allocation5 + $0x60] ss:$16 sps:$4 sm:$0xff]   ;;  %v224_v24 = vld [vmem:[%s3196_s30 + $0x28] sm:$0xff]  ;;  %s4167_s20 = scalar_lea.vmem [#allocation8], %s2283_s18 }
  0x71   : > { %461 = vmatprep.subr.bf16.mxu0 %v2466_v3  ;;  %v2475_v9 = vld [vmem:[#allocation5 + $0x84] ss:$16 sps:$4 sm:$0xff]   ;;  %v2477_v10 = vld [vmem:[#allocation5 + $0x80] ss:$16 sps:$4 sm:$0xff]   ;;  %v226_v27 = vld [vmem:[%s3196_s30 + $0x38] sm:$0xff]  ;;  %s2388_s17 = sshll.u32 %s3041_s16, 13 }
  0x72   : > { %v2478_v11 = vld [vmem:[#allocation5 + $0xa4] ss:$16 sps:$4 sm:$0xff]   ;;  %v2480_v12 = vld [vmem:[#allocation5 + $0xa0] ss:$16 sps:$4 sm:$0xff]   ;;  %v228_v30 = vld [vmem:[%s3196_s30 + $0x48] sm:$0xff]  ;;  %s2179_s24 = sshll.u32 %s4167_s20, 4  ;;  %s4644_s23 = scalar_lea.hbm %s4695_s3, %s2388_s17  ;;  %s4646_s24 = int_to_ptr.vmem [resolvable:$true] %s2179_s24 }
  0x73   : > { %v2481_v13 = vld [vmem:[#allocation5 + $0xc4] ss:$16 sps:$4 sm:$0xff]   ;;  %v2483_v14 = vld [vmem:[#allocation5 + $0xc0] ss:$16 sps:$4 sm:$0xff]   ;;  %v230_v33 = vld [vmem:[%s3196_s30 + $0x58] sm:$0xff]  ;;  %s2165_s5 = scalar_lea.sflag [#allocation4], %s3192_s28 }
  0x74   : > { %462 = vmatpush1.bf16.msra.mxu0 %v2468_v4  ;;  %v2484_v15 = vld [vmem:[#allocation5 + $0xe4] ss:$16 sps:$4 sm:$0xff]   ;;  %v2486_v16 = vld [vmem:[#allocation5 + $0xe0] ss:$16 sps:$4 sm:$0xff]   ;;  %v232_v36 = vld [vmem:[%s3196_s30 + $0x68] sm:$0xff]  ;;  %s2917_s8 = scalar_lea.vmem %s4646_s24, 8192 }
  0x75   : > { %463 = vmatprep.subr.bf16.mxu0 %v2469_v5  ;;  %v219_v17 = vld [vmem:[%s3196_s30] sm:$0xff]  ;;  %v221_v20 = vld [vmem:[%s3196_s30 + $0x10] sm:$0xff]  ;;  %v234_v39 = vld [vmem:[%s3196_s30 + $0x78] sm:$0xff]  ;;  %p2918_p11 = scmp.ne.s32.totalorder %s4646_s24, %s2917_s8  ;;  %p4949_p0 = scmp.ne.s32.totalorder %s4766_s6, 0 }
  0x76   : > { %v3210_v19 = vpack.c.bf16 %v220_v18, %v219_v17  ;;  %v3216_v22 = vpack.c.bf16 %v222_v21, %v221_v20  ;;  %v223_v23 = vld [vmem:[%s3196_s30 + $0x20] sm:$0xff]  ;;  %v225_v26 = vld [vmem:[%s3196_s30 + $0x30] sm:$0xff]  ;;  %v236_v42 = vld [vmem:[%s3196_s30 + $0x88] sm:$0xff]  ;;  %v847_v18 = vlaneseq  ;;  %s2997_s16 = smov [#allocation8]  }
  0x77   : > { %v3222_v25 = vpack.c.bf16 %v224_v24, %v223_v23  ;;  %v3228_v28 = vpack.c.bf16 %v226_v27, %v225_v26  ;;  %v227_v29 = vld [vmem:[%s3196_s30 + $0x40] sm:$0xff]  ;;  %v229_v32 = vld [vmem:[%s3196_s30 + $0x50] sm:$0xff]  ;;  %v238_v45 = vld [vmem:[%s3196_s30 + $0x98] sm:$0xff]  ;;  %p2919_p1 = pnand %p2918_p11, %p4949_p0  ;;  %s2921_s9 = sshll.u32 %s2997_s16, 4  ;;  %s2922_s9 = int_to_ptr.vmem [resolvable:$false] %s2921_s9 }
  0x78   : > { %464 = vmatpush1.bf16.msra.mxu0 %v2471_v6  ;;  %v3234_v31 = vpack.c.bf16 %v228_v30, %v227_v29  ;;  %v3240_v34 = vpack.c.bf16 %v230_v33, %v229_v32  ;;  %v231_v35 = vld [vmem:[%s3196_s30 + $0x60] sm:$0xff]  ;;  %v233_v38 = vld [vmem:[%s3196_s30 + $0x70] sm:$0xff]  ;;  %v240_v48 = vld [vmem:[%s3196_s30 + $0xa8] sm:$0xff]  ;;  %v848_v20 = vshrl.u32 %v847_v18, 7  ;;  %s2923_s25 = scalar_lea.vmem %s2922_s9, 16384  ;;  %p2924_p7 = scmp.lt.s32.totalorder %s4646_s24, %s2922_s9 }
  0x79   : > { %465 = vmatprep.subr.bf16.mxu0 %v2472_v7  ;;  %v3246_v37 = vpack.c.bf16 %v232_v36, %v231_v35  ;;  %v3252_v40 = vpack.c.bf16 %v234_v39, %v233_v38  ;;  %v235_v41 = vld [vmem:[%s3196_s30 + $0x80] sm:$0xff]  ;;  %v237_v44 = vld [vmem:[%s3196_s30 + $0x90] sm:$0xff]  ;;  %v242_v51 = vld [vmem:[%s3196_s30 + $0xb8] sm:$0xff]  ;;  %p2920_p3 = pneg %p2919_p1  ;;  %p2925_p9 = scmp.lt.s32.totalorder %s2923_s25, %s2917_s8 }
  0x7a   : > { %v3258_v43 = vpack.c.bf16 %v236_v42, %v235_v41  ;;  %v3264_v46 = vpack.c.bf16 %v238_v45, %v237_v44  ;;  %v239_v47 = vld [vmem:[%s3196_s30 + $0xa0] sm:$0xff]  ;;  %v241_v50 = vld [vmem:[%s3196_s30 + $0xb0] sm:$0xff]  ;;  %v244_v54 = vld [vmem:[%s3196_s30 + $0xc8] sm:$0xff]  ;;  %v3309_v21 = vsub.s32 0, %v848_v20  ;;  %v3311_v24 = vsub.s32 1, %v848_v20 }
  0x7b   : > { %v3270_v49 = vpack.c.bf16 %v240_v48, %v239_v47  ;;  %v3276_v52 = vpack.c.bf16 %v242_v51, %v241_v50  ;;  %v243_v53 = vld [vmem:[%s3196_s30 + $0xc0] sm:$0xff]  ;;  %v245_v56 = vld [vmem:[%s3196_s30 + $0xd0] sm:$0xff]  ;;  %v246_v57 = vld [vmem:[%s3196_s30 + $0xd8] sm:$0xff]  ;;  %p2926_p12 = por %p2925_p9, %p2924_p7 }
  0x7c   : > { %466 = vmatpush1.bf16.msra.mxu0 %v2474_v8  ;;  %v3282_v55 = vpack.c.bf16 %v244_v54, %v243_v53  ;;  %v3288_v58 = vpack.c.bf16 %v246_v57, %v245_v56  ;;  %v247_v59 = vld [vmem:[%s3196_s30 + $0xe0] sm:$0xff]  ;;  %v248_v60 = vld [vmem:[%s3196_s30 + $0xe8] sm:$0xff]  ;;  %v249_v62 = vld [vmem:[%s3196_s30 + $0xf0] sm:$0xff]  ;;  %4771 = vst [vmem:[#allocation12_spill] sm:$0xff] %v3309_v21 }
  0x7d   : > { %467 = vmatprep.subr.bf16.mxu0 %v2475_v9  ;;  %v3294_v61 = vpack.c.bf16 %v248_v60, %v247_v59  ;;  %v250_v63 = vld [vmem:[%s3196_s30 + $0xf8] sm:$0xff]  ;;  %v845_v23 = vld [vmem:[#allocation7] ss:$4 sm:$0x3]  ;;  %4772 = vst [vmem:[#allocation13_spill] sm:$0xff] %v3311_v24  ;;  %p2927_p2 = pnand %p2926_p12, %p2920_p3 }
  0x7e   : > { %v3300_v1 = vpack.c.bf16 %v250_v63, %v249_v62  ;;  %v2487_v2 = vld [vmem:[#allocation5 + $0xc] ss:$16 sps:$4 sm:$0xff]   ;;  %v2489_v3 = vld [vmem:[#allocation5 + $0x8] ss:$16 sps:$4 sm:$0xff]   ;;  %v3314_v26 = vrot.slane %v845_v23, %v3309_v21 }
  0x7f   : > { %652 = vmatprep.subr.bf16.mxu1 %v2487_v2  ;;  %v2490_v4 = vld [vmem:[#allocation5 + $0x2c] ss:$16 sps:$4 sm:$0xff]   ;;  %v2492_v5 = vld [vmem:[#allocation5 + $0x28] ss:$16 sps:$4 sm:$0xff]  }
  0x80   : > { %468 = vmatpush1.bf16.msra.mxu0 %v2477_v10  ;;  %653 = vmatpush1.bf16.msra.mxu1 %v2489_v3  ;;  %v2493_v6 = vld [vmem:[#allocation5 + $0x4c] ss:$16 sps:$4 sm:$0xff]   ;;  %v2495_v7 = vld [vmem:[#allocation5 + $0x48] ss:$16 sps:$4 sm:$0xff]  }
  0x81   : > { %469 = vmatprep.subr.bf16.mxu0 %v2478_v11  ;;  %654 = vmatprep.subr.bf16.mxu1 %v2490_v4  ;;  %v2496_v8 = vld [vmem:[#allocation5 + $0x6c] ss:$16 sps:$4 sm:$0xff]   ;;  %v2498_v9 = vld [vmem:[#allocation5 + $0x68] ss:$16 sps:$4 sm:$0xff]  }
  0x82   : > { %v2499_v10 = vld [vmem:[#allocation5 + $0x8c] ss:$16 sps:$4 sm:$0xff]   ;;  %v2501_v11 = vld [vmem:[#allocation5 + $0x88] ss:$16 sps:$4 sm:$0xff]  }
  0x83   : > { %v2510_v17 = vld [vmem:[#allocation5 + $0xe8] ss:$16 sps:$4 sm:$0xff]  }
  0x84   : > { %470 = vmatpush1.bf16.msra.mxu0 %v2480_v12  ;;  %655 = vmatpush1.bf16.msra.mxu1 %v2492_v5  ;;  %v2502_v12 = vld [vmem:[#allocation5 + $0xac] ss:$16 sps:$4 sm:$0xff]  }
  0x85   : > { %471 = vmatprep.subr.bf16.mxu0 %v2481_v13  ;;  %656 = vmatprep.subr.bf16.mxu1 %v2493_v6  ;;  %v2504_v13 = vld [vmem:[#allocation5 + $0xa8] ss:$16 sps:$4 sm:$0xff]  }
  0x88   : > { %472 = vmatpush1.bf16.msra.mxu0 %v2483_v14  ;;  %657 = vmatpush1.bf16.msra.mxu1 %v2495_v7  ;;  %v2505_v14 = vld [vmem:[#allocation5 + $0xcc] ss:$16 sps:$4 sm:$0xff]  }
  0x89   : > { %473 = vmatprep.subr.bf16.mxu0 %v2484_v15  ;;  %658 = vmatprep.subr.bf16.mxu1 %v2496_v8  ;;  %v2507_v15 = vld [vmem:[#allocation5 + $0xc8] ss:$16 sps:$4 sm:$0xff]  }
  0x8c   : > { %474 = vmatpush1.bf16.msra.mxu0 %v2486_v16  ;;  %659 = vmatpush1.bf16.msra.mxu1 %v2498_v9  ;;  %v2508_v16 = vld [vmem:[#allocation5 + $0xec] ss:$16 sps:$4 sm:$0xff]  }
  0x8d   : > { %660 = vmatprep.subr.bf16.mxu1 %v2499_v10 }
  0x8f   : > { %492 = vmatmul.mubr.bf16.vlgmr.msra.gmra.mrb[0].mxu0 %v3210_v19 }
  0x90   : > { %501 = vmatprep.mubr.bf16.mxu0 %v2996_v0  ;;  %661 = vmatpush1.bf16.msra.mxu1 %v2501_v11 }
  0x91   : > { %662 = vmatprep.subr.bf16.mxu1 %v2502_v12 }
  0x94   : > { %663 = vmatpush1.bf16.msra.mxu1 %v2504_v13 }
  0x95   : > { %664 = vmatprep.subr.bf16.mxu1 %v2505_v14 }
  0x97   : > { %502 = vmatmul.mubr.bf16.gmra.mrb[4].mxu0 %v3216_v22 }
  0x98   : > { %511 = vmatprep.mubr.bf16.mxu0 %v2996_v0  ;;  %665 = vmatpush1.bf16.msra.mxu1 %v2507_v15 }
  0x99   : > { %666 = vmatprep.subr.bf16.mxu1 %v2508_v16 }
  0x9c   : > { %667 = vmatpush1.bf16.msra.mxu1 %v2510_v17 }
  0x9f   : > { %512 = vmatmul.mubr.bf16.gmra.mrb[8].mxu0 %v3222_v25  ;;  %685 = vmatmul.mubr.bf16.vlgmr.msra.gmra.mrb[0].mxu1 %v3210_v19  ;;  %v3317_v19 = vrot.slane %v845_v23, %v3311_v24 }
  0xa0   : > { %521 = vmatprep.mubr.bf16.mxu0 %v2996_v0  ;;  %694 = vmatprep.mubr.bf16.mxu1 %v2996_v0 }
  0xa7   : > { %522 = vmatmul.mubr.bf16.gmra.mrb[12].mxu0 %v3228_v28  ;;  %695 = vmatmul.mubr.bf16.gmra.mrb[4].mxu1 %v3216_v22 }
  0xa8   : > { %531 = vmatprep.mubr.bf16.mxu0 %v2996_v0  ;;  %704 = vmatprep.mubr.bf16.mxu1 %v2996_v0 }
  0xaf   : > { %532 = vmatmul.mubr.bf16.gmra.mrb[16].mxu0 %v3234_v31  ;;  %705 = vmatmul.mubr.bf16.gmra.mrb[8].mxu1 %v3222_v25 }
  0xb0   : > { %541 = vmatprep.mubr.bf16.mxu0 %v2996_v0  ;;  %714 = vmatprep.mubr.bf16.mxu1 %v2996_v0 }
  0xb7   : > { %542 = vmatmul.mubr.bf16.gmra.mrb[20].mxu0 %v3240_v34  ;;  %715 = vmatmul.mubr.bf16.gmra.mrb[12].mxu1 %v3228_v28 }
  0xb8   : > { %551 = vmatprep.mubr.bf16.mxu0 %v2996_v0  ;;  %724 = vmatprep.mubr.bf16.mxu1 %v2996_v0 }
  0xbf   : > { %552 = vmatmul.mubr.bf16.gmra.mrb[24].mxu0 %v3246_v37  ;;  %725 = vmatmul.mubr.bf16.gmra.mrb[16].mxu1 %v3234_v31 }
  0xc0   : > { %561 = vmatprep.mubr.bf16.mxu0 %v2996_v0  ;;  %734 = vmatprep.mubr.bf16.mxu1 %v2996_v0 }
  0xc7   : > { %562 = vmatmul.mubr.bf16.gmra.mrb[28].mxu0 %v3252_v40  ;;  %735 = vmatmul.mubr.bf16.gmra.mrb[20].mxu1 %v3240_v34 }
  0xc8   : > { %571 = vmatprep.mubr.bf16.mxu0 %v2996_v0  ;;  %744 = vmatprep.mubr.bf16.mxu1 %v2996_v0 }
  0xcf   : > { %572 = vmatmul.mubr.bf16.gmra.mrb[32].mxu0 %v3258_v43  ;;  %745 = vmatmul.mubr.bf16.gmra.mrb[24].mxu1 %v3246_v37 }
  0xd0   : > { %581 = vmatprep.mubr.bf16.mxu0 %v2996_v0  ;;  %754 = vmatprep.mubr.bf16.mxu1 %v2996_v0 }
  0xd7   : > { %582 = vmatmul.mubr.bf16.gmra.mrb[36].mxu0 %v3264_v46  ;;  %755 = vmatmul.mubr.bf16.gmra.mrb[28].mxu1 %v3252_v40 }
  0xd8   : > { %591 = vmatprep.mubr.bf16.mxu0 %v2996_v0  ;;  %764 = vmatprep.mubr.bf16.mxu1 %v2996_v0 }
  0xdf   : > { %592 = vmatmul.mubr.bf16.gmra.mrb[40].mxu0 %v3270_v49  ;;  %765 = vmatmul.mubr.bf16.gmra.mrb[32].mxu1 %v3258_v43 }
  0xe0   : > { %601 = vmatprep.mubr.bf16.mxu0 %v2996_v0  ;;  %774 = vmatprep.mubr.bf16.mxu1 %v2996_v0 }
  0xe7   : > { %602 = vmatmul.mubr.bf16.gmra.mrb[44].mxu0 %v3276_v52  ;;  %775 = vmatmul.mubr.bf16.gmra.mrb[36].mxu1 %v3264_v46 }
  0xe8   : > { %611 = vmatprep.mubr.bf16.mxu0 %v2996_v0  ;;  %784 = vmatprep.mubr.bf16.mxu1 %v2996_v0 }
  0xef   : > { %612 = vmatmul.mubr.bf16.gmra.mrb[48].mxu0 %v3282_v55  ;;  %785 = vmatmul.mubr.bf16.gmra.mrb[40].mxu1 %v3270_v49 }
  0xf0   : > { %621 = vmatprep.mubr.bf16.mxu0 %v2996_v0  ;;  %794 = vmatprep.mubr.bf16.mxu1 %v2996_v0 }
  0xf7   : > { %622 = vmatmul.mubr.bf16.gmra.mrb[52].mxu0 %v3288_v58  ;;  %795 = vmatmul.mubr.bf16.gmra.mrb[44].mxu1 %v3276_v52 }
  0xf8   : > { %631 = vmatprep.mubr.bf16.mxu0 %v2996_v0  ;;  %804 = vmatprep.mubr.bf16.mxu1 %v2996_v0 }
  0xff   : > { %632 = vmatmul.mubr.bf16.gmra.mrb[56].mxu0 %v3294_v61  ;;  %805 = vmatmul.mubr.bf16.gmra.mrb[48].mxu1 %v3282_v55 }
 0x100   : > { %641 = vmatprep.mubr.bf16.mxu0 %v2996_v0  ;;  %814 = vmatprep.mubr.bf16.mxu1 %v2996_v0 }
 0x107   : > { %642 = vmatmul.mubr.bf16.gmra.mrb[60].mxu0 %v3300_v1  ;;  %815 = vmatmul.mubr.bf16.gmra.mrb[52].mxu1 %v3288_v58 }
 0x108   : > { %824 = vmatprep.mubr.bf16.mxu1 %v2996_v0 }
 0x10f   : > { %825 = vmatmul.mubr.bf16.gmra.mrb[56].mxu1 %v3294_v61 }
 0x110   : > { %834 = vmatprep.mubr.bf16.mxu1 %v2996_v0 }
 0x117   : > { %835 = vmatmul.mubr.bf16.gmra.mrb[60].mxu1 %v3300_v1 }
 0x162   : > { %v493_v22 = vpop.f32.mrb[0].mxu0 }
 0x163   : > { %v3322_v25 = vadd.f32 %v3314_v26, %v493_v22  ;;  %v495_v27 = vpop.f32.mrb[1].mxu0 }
 0x164   : > { %v3325_v29 = vadd.f32 %v3317_v19, %v495_v27  ;;  %v497_v30 = vpop.f32.mrb[2].mxu0 }
 0x165   : > { %v499_v32 = vpop.f32.mrb[3].mxu0  ;;  %v3328_v33 = vadd.f32 %v3314_v26, %v497_v30 }
 0x166   : > { %v3331_v35 = vadd.f32 %v3317_v19, %v499_v32  ;;  %v921_v28 = vadd.f32 %v3325_v29, %v3322_v25 }
 0x168   : > { %922 = vadd.xlane.f32.xlu0 %v921_v28  ;;  %v924_v38 = vadd.f32 %v3331_v35, %v3328_v33 }
 0x16a   : > { %v503_v36 = vpop.f32.mrb[4].mxu0 }
 0x16b   : > { %v3340_v39 = vadd.f32 %v3314_v26, %v503_v36  ;;  %v505_v41 = vpop.f32.mrb[5].mxu0 }
 0x16c   : > { %v3343_v42 = vadd.f32 %v3317_v19, %v505_v41  ;;  %925 = vadd.xlane.f32.xlu0 %v924_v38  ;;  %v507_v44 = vpop.f32.mrb[6].mxu0 }
 0x16d   : > { %v509_v45 = vpop.f32.mrb[7].mxu0  ;;  %v3346_v47 = vadd.f32 %v3314_v26, %v507_v44 }
 0x16e   : > { %v3349_v31 = vadd.f32 %v3317_v19, %v509_v45  ;;  %v927_v48 = vadd.f32 %v3343_v42, %v3340_v39 }
 0x170   : > { %928 = vadd.xlane.f32.xlu1 %v927_v48  ;;  %v930_v51 = vadd.f32 %v3349_v31, %v3346_v47 }
 0x172   : > { %v513_v50 = vpop.f32.mrb[8].mxu0 }
 0x173   : > { %v3358_v53 = vadd.f32 %v3314_v26, %v513_v50  ;;  %v515_v54 = vpop.f32.mrb[9].mxu0 }
 0x174   : > { %v3361_v56 = vadd.f32 %v3317_v19, %v515_v54  ;;  %931 = vadd.xlane.f32.xlu1 %v930_v51  ;;  %v517_v57 = vpop.f32.mrb[10].mxu0 }
 0x175   : > { %v3364_v59 = vadd.f32 %v3314_v26, %v517_v57  ;;  %v519_v60 = vpop.f32.mrb[11].mxu0 }
 0x176   : > { %v3367_v34 = vadd.f32 %v3317_v19, %v519_v60  ;;  %v933_v62 = vadd.f32 %v3361_v56, %v3358_v53 }
 0x178   : > { %934 = vadd.xlane.f32.xlu0 %v933_v62  ;;  %v936_v63 = vadd.f32 %v3367_v34, %v3364_v59 }
 0x17a   : > { %937 = vadd.xlane.f32.xlu1 %v936_v63  ;;  %v523_v2 = vpop.f32.mrb[12].mxu0 }
 0x17b   : > { %v3376_v3 = vadd.f32 %v3314_v26, %v523_v2  ;;  %v525_v4 = vpop.f32.mrb[13].mxu0 }
 0x17c   : > { %v3379_v5 = vadd.f32 %v3317_v19, %v525_v4  ;;  %v527_v6 = vpop.f32.mrb[14].mxu0 }
 0x17d   : > { %v3382_v7 = vadd.f32 %v3314_v26, %v527_v6  ;;  %v529_v8 = vpop.f32.mrb[15].mxu0 }
 0x17e   : > { %v3385_v9 = vadd.f32 %v3317_v19, %v529_v8  ;;  %v939_v37 = vadd.f32 %v3379_v5, %v3376_v3 }
 0x180   : > { %940 = vadd.xlane.f32.xlu0 %v939_v37  ;;  %v942_v10 = vadd.f32 %v3385_v9, %v3382_v7 }
 0x182   : > { %943 = vadd.xlane.f32.xlu1 %v942_v10  ;;  %v533_v11 = vpop.f32.mrb[16].mxu0 }
 0x183   : > { %v3394_v12 = vadd.f32 %v3314_v26, %v533_v11  ;;  %v535_v13 = vpop.f32.mrb[17].mxu0 }
 0x184   : > { %v3397_v14 = vadd.f32 %v3317_v19, %v535_v13  ;;  %v537_v15 = vpop.f32.mrb[18].mxu0 }
 0x185   : > { %v3400_v16 = vadd.f32 %v3314_v26, %v537_v15  ;;  %v539_v17 = vpop.f32.mrb[19].mxu0 }
 0x186   : > { %v3403_v18 = vadd.f32 %v3317_v19, %v539_v17  ;;  %v945_v40 = vadd.f32 %v3397_v14, %v3394_v12 }
 0x188   : > { %946 = vadd.xlane.f32.xlu0 %v945_v40  ;;  %v948_v20 = vadd.f32 %v3403_v18, %v3400_v16 }
 0x18a   : > { %949 = vadd.xlane.f32.xlu1 %v948_v20  ;;  %v543_v23 = vpop.f32.mrb[20].mxu0 }
 0x18b   : > { %v3412_v22 = vadd.f32 %v3314_v26, %v543_v23  ;;  %v545_v27 = vpop.f32.mrb[21].mxu0 }
 0x18c   : > { %v3415_v30 = vadd.f32 %v3317_v19, %v545_v27  ;;  %v547_v32 = vpop.f32.mrb[22].mxu0 }
 0x18d   : > { %v3418_v28 = vadd.f32 %v3314_v26, %v547_v32  ;;  %v549_v36 = vpop.f32.mrb[23].mxu0 }
 0x18e   : > { %v3421_v38 = vadd.f32 %v3317_v19, %v549_v36  ;;  %v951_v43 = vadd.f32 %v3415_v30, %v3412_v22 }
 0x190   : > { %952 = vadd.xlane.f32.xlu0 %v951_v43  ;;  %v954_v41 = vadd.f32 %v3421_v38, %v3418_v28 }
 0x192   : > { %955 = vadd.xlane.f32.xlu1 %v954_v41  ;;  %v553_v44 = vpop.f32.mrb[24].mxu0 }
 0x193   : > { %v3430_v45 = vadd.f32 %v3314_v26, %v553_v44  ;;  %v555_v48 = vpop.f32.mrb[25].mxu0 }
 0x194   : > { %v3433_v50 = vadd.f32 %v3317_v19, %v555_v48  ;;  %v557_v51 = vpop.f32.mrb[26].mxu0 }
 0x195   : > { %v3436_v54 = vadd.f32 %v3314_v26, %v557_v51  ;;  %v559_v57 = vpop.f32.mrb[27].mxu0 }
 0x196   : > { %v3439_v60 = vadd.f32 %v3317_v19, %v559_v57  ;;  %v957_v46 = vadd.f32 %v3433_v50, %v3430_v45 }
 0x198   : > { %958 = vadd.xlane.f32.xlu0 %v957_v46  ;;  %v960_v62 = vadd.f32 %v3439_v60, %v3436_v54 }
 0x19a   : > { %961 = vadd.xlane.f32.xlu1 %v960_v62  ;;  %v563_v63 = vpop.f32.mrb[28].mxu0 }
 0x19b   : > { %v3448_v2 = vadd.f32 %v3314_v26, %v563_v63  ;;  %v565_v4 = vpop.f32.mrb[29].mxu0 }
 0x19c   : > { %v3451_v6 = vadd.f32 %v3317_v19, %v565_v4  ;;  %v567_v8 = vpop.f32.mrb[30].mxu0 }
 0x19d   : > { %v3454_v37 = vadd.f32 %v3314_v26, %v567_v8  ;;  %v569_v10 = vpop.f32.mrb[31].mxu0 }
 0x19e   : > { %v3457_v11 = vadd.f32 %v3317_v19, %v569_v10  ;;  %v963_v49 = vadd.f32 %v3451_v6, %v3448_v2 }
 0x1a0   : > { %964 = vadd.xlane.f32.xlu0 %v963_v49  ;;  %v966_v13 = vadd.f32 %v3457_v11, %v3454_v37 }
 0x1a2   : > { %967 = vadd.xlane.f32.xlu1 %v966_v13  ;;  %v573_v15 = vpop.f32.mrb[32].mxu0 }
 0x1a3   : > { %v3466_v17 = vadd.f32 %v3314_v26, %v573_v15  ;;  %v575_v40 = vpop.f32.mrb[33].mxu0 }
 0x1a4   : > { %v3469_v20 = vadd.f32 %v3317_v19, %v575_v40  ;;  %v577_v23 = vpop.f32.mrb[34].mxu0 }
 0x1a5   : > { %v3472_v27 = vadd.f32 %v3314_v26, %v577_v23  ;;  %v579_v32 = vpop.f32.mrb[35].mxu0 }
 0x1a6   : > { %v3475_v36 = vadd.f32 %v3317_v19, %v579_v32  ;;  %v969_v52 = vadd.f32 %v3469_v20, %v3466_v17 }
 0x1a8   : > { %970 = vadd.xlane.f32.xlu0 %v969_v52  ;;  %v972_v43 = vadd.f32 %v3475_v36, %v3472_v27 }
 0x1aa   : > { %973 = vadd.xlane.f32.xlu1 %v972_v43  ;;  %v583_v41 = vpop.f32.mrb[36].mxu0 }
 0x1ab   : > { %v3484_v44 = vadd.f32 %v3314_v26, %v583_v41  ;;  %v585_v48 = vpop.f32.mrb[37].mxu0 }
 0x1ac   : > { %v3487_v51 = vadd.f32 %v3317_v19, %v585_v48  ;;  %v587_v57 = vpop.f32.mrb[38].mxu0 }
 0x1ad   : > { %v3490_v46 = vadd.f32 %v3314_v26, %v587_v57  ;;  %v589_v62 = vpop.f32.mrb[39].mxu0 }
 0x1ae   : > { %v3493_v63 = vadd.f32 %v3317_v19, %v589_v62  ;;  %v975_v55 = vadd.f32 %v3487_v51, %v3484_v44 }
 0x1b0   : > { %976 = vadd.xlane.f32.xlu0 %v975_v55  ;;  %v978_v4 = vadd.f32 %v3493_v63, %v3490_v46 }
 0x1b2   : > { %979 = vadd.xlane.f32.xlu1 %v978_v4  ;;  %v593_v8 = vpop.f32.mrb[40].mxu0 }
 0x1b3   : > { %v3502_v10 = vadd.f32 %v3314_v26, %v593_v8  ;;  %v595_v49 = vpop.f32.mrb[41].mxu0 }
 0x1b4   : > { %v3505_v13 = vadd.f32 %v3317_v19, %v595_v49  ;;  %v597_v15 = vpop.f32.mrb[42].mxu0 }
 0x1b5   : > { %v3508_v40 = vadd.f32 %v3314_v26, %v597_v15  ;;  %v599_v23 = vpop.f32.mrb[43].mxu0 }
 0x1b6   : > { %v3511_v32 = vadd.f32 %v3317_v19, %v599_v23  ;;  %v981_v58 = vadd.f32 %v3505_v13, %v3502_v10 }
 0x1b8   : > { %982 = vadd.xlane.f32.xlu0 %v981_v58  ;;  %v984_v52 = vadd.f32 %v3511_v32, %v3508_v40 }
 0x1ba   : > { %985 = vadd.xlane.f32.xlu1 %v984_v52  ;;  %v603_v43 = vpop.f32.mrb[44].mxu0 }
 0x1bb   : > { %v3520_v41 = vadd.f32 %v3314_v26, %v603_v43  ;;  %v605_v48 = vpop.f32.mrb[45].mxu0 }
 0x1bc   : > { %v3523_v57 = vadd.f32 %v3317_v19, %v605_v48  ;;  %v607_v62 = vpop.f32.mrb[46].mxu0 }
 0x1bd   : > { %v3526_v55 = vadd.f32 %v3314_v26, %v607_v62  ;;  %v609_v4 = vpop.f32.mrb[47].mxu0 }
 0x1be   : > { %v3529_v8 = vadd.f32 %v3317_v19, %v609_v4  ;;  %v987_v61 = vadd.f32 %v3523_v57, %v3520_v41 }
 0x1c0   : > { %988 = vadd.xlane.f32.xlu0 %v987_v61  ;;  %v990_v0 = vadd.f32 %v3529_v8, %v3526_v55 }
 0x1c2   : > { %991 = vadd.xlane.f32.xlu1 %v990_v0  ;;  %v613_v49 = vpop.f32.mrb[48].mxu0 }
 0x1c3   : > { %v3537_v15 = vadd.f32 %v3314_v26, %v613_v49  ;;  %v615_v23 = vpop.f32.mrb[49].mxu0 }
 0x1c4   : > { %v3540_v58 = vadd.f32 %v3317_v19, %v615_v23  ;;  %v617_v52 = vpop.f32.mrb[50].mxu0 }
 0x1c5   : > { %v3543_v43 = vadd.f32 %v3314_v26, %v617_v52  ;;  %v619_v48 = vpop.f32.mrb[51].mxu0 }
 0x1c6   : > { %4773 = vst [vmem:[#allocation14_spill] sm:$0xff] %v3540_v58  ;;  %v3546_v62 = vadd.f32 %v3317_v19, %v619_v48  ;;  %v993_v1 = vadd.f32 %v3540_v58, %v3537_v15 }
 0x1c7   : > { %4774 = vst [vmem:[#allocation15_spill] sm:$0xff] %v3543_v43 }
 0x1c8   : > { %4775 = vst [vmem:[#allocation16_spill] sm:$0xff] %v3546_v62  ;;  %994 = vadd.xlane.f32.xlu0 %v993_v1  ;;  %v996_v4 = vadd.f32 %v3546_v62, %v3543_v43 }
 0x1ca   : > { %997 = vadd.xlane.f32.xlu1 %v996_v4  ;;  %v623_v61 = vpop.f32.mrb[52].mxu0 }
 0x1cb   : > { %v3553_v0 = vadd.f32 %v3314_v26, %v623_v61  ;;  %v625_v49 = vpop.f32.mrb[53].mxu0 }
 0x1cc   : > { %v3556_v23 = vadd.f32 %v3317_v19, %v625_v49  ;;  %v627_v52 = vpop.f32.mrb[54].mxu0 }
 0x1cd   : > { %4776 = vst [vmem:[#allocation17_spill] sm:$0xff] %v3553_v0  ;;  %v3559_v48 = vadd.f32 %v3314_v26, %v627_v52  ;;  %v629_v24 = vpop.f32.mrb[55].mxu0 }
 0x1ce   : > { %4777 = vst [vmem:[#allocation18_spill] sm:$0xff] %v3556_v23  ;;  %v3562_v21 = vadd.f32 %v3317_v19, %v629_v24  ;;  %v999_v1 = vadd.f32 %v3556_v23, %v3553_v0 }
 0x1cf   : > { %4778 = vst [vmem:[#allocation19_spill] sm:$0xff] %v3559_v48 }
 0x1d0   : > { %4779 = vst [vmem:[#allocation20_spill] sm:$0xff] %v3562_v21  ;;  %1000 = vadd.xlane.f32.xlu0 %v999_v1  ;;  %v1002_v4 = vadd.f32 %v3562_v21, %v3559_v48 }
 0x1d2   : > { %1003 = vadd.xlane.f32.xlu1 %v1002_v4  ;;  %v633_v61 = vpop.f32.mrb[56].mxu0 }
 0x1d3   : > { %v3569_v49 = vadd.f32 %v3314_v26, %v633_v61  ;;  %v635_v62 = vpop.f32.mrb[57].mxu0 }
 0x1d4   : > { %v3572_v52 = vadd.f32 %v3317_v19, %v635_v62  ;;  %v637_v43 = vpop.f32.mrb[58].mxu0 }
 0x1d5   : > { %v3575_v24 = vadd.f32 %v3314_v26, %v637_v43  ;;  %v639_v58 = vpop.f32.mrb[59].mxu0 }
 0x1d6   : > { %4780 = vst [vmem:[#allocation21_spill] sm:$0xff] %v3572_v52  ;;  %v3578_v23 = vadd.f32 %v3317_v19, %v639_v58  ;;  %v1005_v1 = vadd.f32 %v3572_v52, %v3569_v49 }
 0x1d7   : > { %4781 = vst [vmem:[#allocation22_spill] sm:$0xff] %v3575_v24 }
 0x1d8   : > { %4782 = vst [vmem:[#allocation23_spill] sm:$0xff] %v3578_v23  ;;  %1006 = vadd.xlane.f32.xlu0 %v1005_v1  ;;  %v1008_v4 = vadd.f32 %v3578_v23, %v3575_v24 }
 0x1da   : > { %1009 = vadd.xlane.f32.xlu1 %v1008_v4  ;;  %v643_v61 = vpop.f32.mrb[60].mxu0 }
 0x1db   : > { %v3585_v62 = vadd.f32 %v3314_v26, %v643_v61  ;;  %v645_v21 = vpop.f32.mrb[61].mxu0 }
 0x1dc   : > { %v3588_v43 = vadd.f32 %v3317_v19, %v645_v21  ;;  %v647_v48 = vpop.f32.mrb[62].mxu0 }
 0x1dd   : > { %v3591_v58 = vadd.f32 %v3314_v26, %v647_v48  ;;  %v649_v0 = vpop.f32.mrb[63].mxu0 }
 0x1de   : > { %v3594_v52 = vadd.f32 %v3317_v19, %v649_v0  ;;  %v1011_v1 = vadd.f32 %v3588_v43, %v3585_v62 }
 0x1e0   : > { %4783 = vst [vmem:[#allocation24_spill] sm:$0xff] %v3594_v52  ;;  %1012 = vadd.xlane.f32.xlu0 %v1011_v1  ;;  %v1014_v4 = vadd.f32 %v3594_v52, %v3591_v58 }
 0x1e2   : > { %1015 = vadd.xlane.f32.xlu1 %v1014_v4 }
 0x1f5   : > { %v923_v61 = vpop.xlane.xlu0 %922 }
 0x1f6   : > { %v1018_v23 = vmul.f32 0.00390625, %v923_v61 }
 0x1f8   : > { %v3601_v21 = vsub.f32 %v3322_v25, %v1018_v23  ;;  %v3604_v26 = vsub.f32 %v3325_v29, %v1018_v23 }
 0x1f9   : > { %v926_v48 = vpop.xlane.xlu0 %925 }
 0x1fa   : > { %4784 = vst [vmem:[#allocation25_spill] sm:$0xff] %v3601_v21  ;;  %4785 = vst [vmem:[#allocation26_spill] sm:$0xff] %v3604_v26  ;;  %v1019_v24 = vmul.f32 0.00390625, %v926_v48  ;;  %v1114_v19 = vmul.f32 %v3601_v21, %v3601_v21  ;;  %v1115_v0 = vmul.f32 %v3604_v26, %v3604_v26 }
 0x1fc   : > { %v3611_v1 = vsub.f32 %v3328_v33, %v1019_v24  ;;  %v3614_v4 = vsub.f32 %v3331_v35, %v1019_v24  ;;  %v1178_v61 = vadd.f32 %v1115_v0, %v1114_v19 }
 0x1fd   : > { %v929_v25 = vpop.xlane.xlu1 %928 }
 0x1fe   : > { %v1020_v52 = vmul.f32 0.00390625, %v929_v25  ;;  %1179 = vadd.xlane.f32.xlu0 %v1178_v61  ;;  %v1116_v29 = vmul.f32 %v3611_v1, %v3611_v1  ;;  %v1117_v23 = vmul.f32 %v3614_v4, %v3614_v4 }
 0x200   : > { %v3621_v48 = vsub.f32 %v3340_v39, %v1020_v52  ;;  %v3624_v26 = vsub.f32 %v3343_v42, %v1020_v52  ;;  %v1181_v33 = vadd.f32 %v1117_v23, %v1116_v29 }
 0x201   : > { %v932_v21 = vpop.xlane.xlu1 %931 }
 0x202   : > { %v1021_v35 = vmul.f32 0.00390625, %v932_v21  ;;  %1182 = vadd.xlane.f32.xlu1 %v1181_v33  ;;  %v1118_v24 = vmul.f32 %v3621_v48, %v3621_v48  ;;  %v1119_v19 = vmul.f32 %v3624_v26, %v3624_v26 }
 0x204   : > { %v3631_v0 = vsub.f32 %v3346_v47, %v1021_v35  ;;  %v3634_v61 = vsub.f32 %v3349_v31, %v1021_v35  ;;  %v1184_v39 = vadd.f32 %v1119_v19, %v1118_v24 }
 0x205   : > { %v935_v25 = vpop.xlane.xlu0 %934 }
 0x206   : > { %v1022_v42 = vmul.f32 0.00390625, %v935_v25  ;;  %1185 = vadd.xlane.f32.xlu0 %v1184_v39  ;;  %v1120_v52 = vmul.f32 %v3631_v0, %v3631_v0  ;;  %v1121_v21 = vmul.f32 %v3634_v61, %v3634_v61 }
 0x207   : > { %v938_v29 = vpop.xlane.xlu1 %937 }
 0x208   : > { %v3641_v23 = vsub.f32 %v3358_v53, %v1022_v42  ;;  %v3644_v47 = vsub.f32 %v3361_v56, %v1022_v42  ;;  %v1023_v33 = vmul.f32 0.00390625, %v938_v29  ;;  %v1187_v31 = vadd.f32 %v1121_v21, %v1120_v52 }
 0x20a   : > { %v3647_v35 = vsub.f32 %v3364_v59, %v1023_v33  ;;  %v3650_v24 = vsub.f32 %v3367_v34, %v1023_v33  ;;  %1188 = vadd.xlane.f32.xlu1 %v1187_v31  ;;  %v1122_v19 = vmul.f32 %v3641_v23, %v3641_v23  ;;  %v1123_v39 = vmul.f32 %v3644_v47, %v3644_v47 }
 0x20c   : > { %v1190_v53 = vadd.f32 %v1123_v39, %v1122_v19  ;;  %v1124_v56 = vmul.f32 %v3647_v35, %v3647_v35  ;;  %v1125_v25 = vmul.f32 %v3650_v24, %v3650_v24 }
 0x20d   : > { %v941_v42 = vpop.xlane.xlu0 %940 }
 0x20e   : > { %v1024_v59 = vmul.f32 0.00390625, %v941_v42  ;;  %1191 = vadd.xlane.f32.xlu0 %v1190_v53  ;;  %v1193_v52 = vadd.f32 %v1125_v25, %v1124_v56 }
 0x20f   : > { %v944_v34 = vpop.xlane.xlu1 %943 }
 0x210   : > { %v3661_v21 = vsub.f32 %v3376_v3, %v1024_v59  ;;  %v3664_v29 = vsub.f32 %v3379_v5, %v1024_v59  ;;  %v1025_v33 = vmul.f32 0.00390625, %v944_v34  ;;  %1194 = vadd.xlane.f32.xlu1 %v1193_v52 }
 0x212   : > { %v3667_v31 = vsub.f32 %v3382_v7, %v1025_v33  ;;  %v3670_v19 = vsub.f32 %v3385_v9, %v1025_v33  ;;  %v1126_v39 = vmul.f32 %v3661_v21, %v3661_v21  ;;  %v1127_v53 = vmul.f32 %v3664_v29, %v3664_v29 }
 0x214   : > { %v1196_v56 = vadd.f32 %v1127_v53, %v1126_v39  ;;  %v1128_v3 = vmul.f32 %v3667_v31, %v3667_v31  ;;  %v1129_v5 = vmul.f32 %v3670_v19, %v3670_v19 }
 0x215   : > { %v947_v25 = vpop.xlane.xlu0 %946 }
 0x216   : > { %v1026_v42 = vmul.f32 0.00390625, %v947_v25  ;;  %1197 = vadd.xlane.f32.xlu0 %v1196_v56  ;;  %v1199_v7 = vadd.f32 %v1129_v5, %v1128_v3  ;;  %v3700_v5 = vpop.f32.mrb[0].mxu1 }
 0x217   : > { %v950_v59 = vpop.xlane.xlu1 %949  ;;  %v3702_v25 = vpop.f32.mrb[1].mxu1 }
 0x218   : > { %v3681_v9 = vsub.f32 %v3394_v12, %v1026_v42  ;;  %v3684_v52 = vsub.f32 %v3397_v14, %v1026_v42  ;;  %v1027_v34 = vmul.f32 0.00390625, %v950_v59  ;;  %1200 = vadd.xlane.f32.xlu1 %v1199_v7  ;;  %v3704_v59 = vpop.f32.mrb[2].mxu1 }
 0x21a   : > { %v3687_v33 = vsub.f32 %v3400_v16, %v1027_v34  ;;  %v3690_v39 = vsub.f32 %v3403_v18, %v1027_v34  ;;  %v1130_v53 = vmul.f32 %v3681_v9, %v3681_v9  ;;  %v1131_v56 = vmul.f32 %v3684_v52, %v3684_v52 }
 0x21c   : > { %4786 = vst [vmem:[#allocation27_spill] sm:$0xff] %v3687_v33  ;;  %4787 = vst [vmem:[#allocation28_spill] sm:$0xff] %v3690_v39  ;;  %v1202_v3 = vadd.f32 %v1131_v56, %v1130_v53  ;;  %v1132_v12 = vmul.f32 %v3687_v33, %v3687_v33  ;;  %v1133_v14 = vmul.f32 %v3690_v39, %v3690_v39  ;;  %v3712_v39 = vpop.f32.mrb[3].mxu1 }
 0x21d   : > { %v953_v16 = vpop.xlane.xlu0 %952 }
 0x21e   : > { %v1028_v18 = vmul.f32 0.00390625, %v953_v16  ;;  %1203 = vadd.xlane.f32.xlu0 %v1202_v3  ;;  %v1205_v42 = vadd.f32 %v1133_v14, %v1132_v12 }
 0x21f   : > { %v956_v7 = vpop.xlane.xlu1 %955 }
 0x220   : > { %v3707_v34 = vsub.f32 %v3412_v22, %v1028_v18  ;;  %v3710_v53 = vsub.f32 %v3415_v30, %v1028_v18  ;;  %v1029_v56 = vmul.f32 0.00390625, %v956_v7  ;;  %1206 = vadd.xlane.f32.xlu1 %v1205_v42  ;;  %v3728_v42 = vpop.f32.mrb[4].mxu1 }
 0x221   : > { %v3730_v7 = vpop.f32.mrb[5].mxu1 }
 0x222   : > { %4788 = vst [vmem:[#allocation29_spill] sm:$0xff] %v3707_v34  ;;  %4789 = vst [vmem:[#allocation30_spill] sm:$0xff] %v3710_v53  ;;  %v3715_v33 = vsub.f32 %v3418_v28, %v1029_v56  ;;  %v3718_v16 = vsub.f32 %v3421_v38, %v1029_v56  ;;  %v1134_v3 = vmul.f32 %v3707_v34, %v3707_v34 }
 0x223   : > { %v1135_v22 = vmul.f32 %v3710_v53, %v3710_v53 }
 0x224   : > { %4790 = vst [vmem:[#allocation31_spill] sm:$0xff] %v3715_v33  ;;  %4791 = vst [vmem:[#allocation32_spill] sm:$0xff] %v3718_v16  ;;  %v1136_v30 = vmul.f32 %v3715_v33, %v3715_v33  ;;  %v1137_v14 = vmul.f32 %v3718_v16, %v3718_v16  ;;  %v3738_v33 = vpop.f32.mrb[6].mxu1 }
 0x225   : > { %v1208_v12 = vadd.f32 %v1135_v22, %v1134_v3  ;;  %v959_v18 = vpop.xlane.xlu0 %958  ;;  %v3740_v16 = vpop.f32.mrb[7].mxu1 }
 0x226   : > { %v1030_v28 = vmul.f32 0.00390625, %v959_v18  ;;  %v1211_v38 = vadd.f32 %v1137_v14, %v1136_v30 }
 0x227   : > { %1209 = vadd.xlane.f32.xlu0 %v1208_v12  ;;  %v962_v56 = vpop.xlane.xlu1 %961 }
 0x228   : > { %v3733_v34 = vsub.f32 %v3430_v45, %v1030_v28  ;;  %v3736_v3 = vsub.f32 %v3433_v50, %v1030_v28  ;;  %v1031_v22 = vmul.f32 0.00390625, %v962_v56  ;;  %1212 = vadd.xlane.f32.xlu1 %v1211_v38 }
 0x22a   : > { %4792 = vst [vmem:[#allocation33_spill] sm:$0xff] %v3733_v34  ;;  %v3743_v53 = vsub.f32 %v3436_v54, %v1031_v22  ;;  %v3746_v12 = vsub.f32 %v3439_v60, %v1031_v22  ;;  %v1138_v30 = vmul.f32 %v3733_v34, %v3733_v34  ;;  %v1139_v45 = vmul.f32 %v3736_v3, %v3736_v3  ;;  %v3756_v60 = vpop.f32.mrb[8].mxu1 }
 0x22c   : > { %4793 = vst [vmem:[#allocation34_spill] sm:$0xff] %v3743_v53  ;;  %4794 = vst [vmem:[#allocation35_spill] sm:$0xff] %v3746_v12  ;;  %v1214_v50 = vadd.f32 %v1139_v45, %v1138_v30  ;;  %v1140_v14 = vmul.f32 %v3743_v53, %v3743_v53  ;;  %v1141_v18 = vmul.f32 %v3746_v12, %v3746_v12  ;;  %v3764_v45 = vpop.f32.mrb[9].mxu1 }
 0x22d   : > { %v965_v28 = vpop.xlane.xlu0 %964 }
 0x22e   : > { %v1032_v38 = vmul.f32 0.00390625, %v965_v28  ;;  %1215 = vadd.xlane.f32.xlu0 %v1214_v50  ;;  %v1217_v54 = vadd.f32 %v1141_v18, %v1140_v14 }
 0x22f   : > { %v968_v56 = vpop.xlane.xlu1 %967 }
 0x230   : > { %v3759_v22 = vsub.f32 %v3448_v2, %v1032_v38  ;;  %v3762_v34 = vsub.f32 %v3451_v6, %v1032_v38  ;;  %v1033_v30 = vmul.f32 0.00390625, %v968_v56  ;;  %1218 = vadd.xlane.f32.xlu1 %v1217_v54  ;;  %v3780_v54 = vpop.f32.mrb[10].mxu1 }
 0x231   : > { %v3782_v56 = vpop.f32.mrb[11].mxu1 }
 0x232   : > { %4795 = vst [vmem:[#allocation36_spill] sm:$0xff] %v3759_v22  ;;  %4796 = vst [vmem:[#allocation37_spill] sm:$0xff] %v3762_v34  ;;  %v3767_v53 = vsub.f32 %v3454_v37, %v1033_v30  ;;  %v3770_v28 = vsub.f32 %v3457_v11, %v1033_v30  ;;  %v1142_v50 = vmul.f32 %v3759_v22, %v3759_v22 }
 0x233   : > { %v1143_v2 = vmul.f32 %v3762_v34, %v3762_v34  ;;  %v4827_v34 = vld [vmem:[#allocation18_spill] sm:$0xff] }
 0x234   : > { %4797 = vst [vmem:[#allocation38_spill] sm:$0xff] %v3767_v53  ;;  %4798 = vst [vmem:[#allocation39_spill] sm:$0xff] %v3770_v28  ;;  %v1144_v6 = vmul.f32 %v3767_v53, %v3767_v53  ;;  %v1145_v18 = vmul.f32 %v3770_v28, %v3770_v28 }
 0x235   : > { %v1220_v14 = vadd.f32 %v1143_v2, %v1142_v50  ;;  %v971_v38 = vpop.xlane.xlu0 %970 }
 0x236   : > { %v1034_v37 = vmul.f32 0.00390625, %v971_v38  ;;  %v1223_v11 = vadd.f32 %v1145_v18, %v1144_v6  ;;  %v3800_v18 = vpop.f32.mrb[12].mxu1 }
 0x237   : > { %1221 = vadd.xlane.f32.xlu0 %v1220_v14  ;;  %v974_v30 = vpop.xlane.xlu1 %973 }
 0x238   : > { %v3785_v22 = vsub.f32 %v3466_v17, %v1034_v37  ;;  %v3788_v50 = vsub.f32 %v3469_v20, %v1034_v37  ;;  %v1035_v2 = vmul.f32 0.00390625, %v974_v30  ;;  %1224 = vadd.xlane.f32.xlu1 %v1223_v11 }
 0x23a   : > { %4799 = vst [vmem:[#allocation40_spill] sm:$0xff] %v3785_v22  ;;  %4800 = vst [vmem:[#allocation41_spill] sm:$0xff] %v3788_v50  ;;  %v3791_v53 = vsub.f32 %v3472_v27, %v1035_v2  ;;  %v3794_v28 = vsub.f32 %v3475_v36, %v1035_v2  ;;  %v1146_v14 = vmul.f32 %v3785_v22, %v3785_v22  ;;  %v3806_v27 = vpop.f32.mrb[13].mxu1 }
 0x23b   : > { %v1147_v6 = vmul.f32 %v3788_v50, %v3788_v50 }
 0x23c   : > { %4801 = vst [vmem:[#allocation42_spill] sm:$0xff] %v3791_v53  ;;  %4802 = vst [vmem:[#allocation43_spill] sm:$0xff] %v3794_v28  ;;  %v1148_v20 = vmul.f32 %v3791_v53, %v3791_v53  ;;  %v1149_v38 = vmul.f32 %v3794_v28, %v3794_v28 }
 0x23d   : > { %v1226_v17 = vadd.f32 %v1147_v6, %v1146_v14  ;;  %v977_v37 = vpop.xlane.xlu0 %976  ;;  %v3814_v6 = vpop.f32.mrb[14].mxu1 }
 0x23e   : > { %v1036_v36 = vmul.f32 0.00390625, %v977_v37  ;;  %v1229_v11 = vadd.f32 %v1149_v38, %v1148_v20  ;;  %v3816_v53 = vpop.f32.mrb[15].mxu1 }
 0x23f   : > { %1227 = vadd.xlane.f32.xlu0 %v1226_v17  ;;  %v980_v30 = vpop.xlane.xlu1 %979 }
 0x240   : > { %v3809_v2 = vsub.f32 %v3484_v44, %v1036_v36  ;;  %v3812_v50 = vsub.f32 %v3487_v51, %v1036_v36  ;;  %v1037_v14 = vmul.f32 0.00390625, %v980_v30  ;;  %1230 = vadd.xlane.f32.xlu1 %v1229_v11  ;;  %v3832_v30 = vpop.f32.mrb[16].mxu1 }
 0x242   : > { %4803 = vst [vmem:[#allocation44_spill] sm:$0xff] %v3809_v2  ;;  %4804 = vst [vmem:[#allocation45_spill] sm:$0xff] %v3812_v50  ;;  %v3819_v28 = vsub.f32 %v3490_v46, %v1037_v14  ;;  %v3822_v37 = vsub.f32 %v3493_v63, %v1037_v14  ;;  %v1150_v17 = vmul.f32 %v3809_v2, %v3809_v2  ;;  %v3834_v14 = vpop.f32.mrb[17].mxu1 }
 0x243   : > { %v1151_v44 = vmul.f32 %v3812_v50, %v3812_v50  ;;  %v4820_v50 = vld [vmem:[#allocation16_spill] sm:$0xff] }
 0x244   : > { %4805 = vst [vmem:[#allocation46_spill] sm:$0xff] %v3819_v28  ;;  %4806 = vst [vmem:[#allocation47_spill] sm:$0xff] %v3822_v37  ;;  %v1152_v20 = vmul.f32 %v3819_v28, %v3819_v28  ;;  %v1153_v38 = vmul.f32 %v3822_v37, %v3822_v37 }
 0x245   : > { %v1232_v51 = vadd.f32 %v1151_v44, %v1150_v17  ;;  %v983_v36 = vpop.xlane.xlu0 %982 }
 0x246   : > { %v1038_v11 = vmul.f32 0.00390625, %v983_v36  ;;  %v1235_v46 = vadd.f32 %v1153_v38, %v1152_v20  ;;  %v3852_v38 = vpop.f32.mrb[18].mxu1 }
 0x247   : > { %1233 = vadd.xlane.f32.xlu0 %v1232_v51  ;;  %v986_v63 = vpop.xlane.xlu1 %985 }
 0x248   : > { %v3837_v2 = vsub.f32 %v3502_v10, %v1038_v11  ;;  %v3840_v17 = vsub.f32 %v3505_v13, %v1038_v11  ;;  %v1039_v44 = vmul.f32 0.00390625, %v986_v63  ;;  %1236 = vadd.xlane.f32.xlu1 %v1235_v46  ;;  %v3854_v10 = vpop.f32.mrb[19].mxu1 }
 0x24a   : > { %4807 = vst [vmem:[#allocation48_spill] sm:$0xff] %v3837_v2  ;;  %4808 = vst [vmem:[#allocation49_spill] sm:$0xff] %v3840_v17  ;;  %v3843_v28 = vsub.f32 %v3508_v40, %v1039_v44  ;;  %v3846_v36 = vsub.f32 %v3511_v32, %v1039_v44  ;;  %v1154_v51 = vmul.f32 %v3837_v2, %v3837_v2 }
 0x24b   : > { %v1155_v20 = vmul.f32 %v3840_v17, %v3840_v17 }
 0x24c   : > { %4809 = vst [vmem:[#allocation50_spill] sm:$0xff] %v3843_v28  ;;  %4810 = vst [vmem:[#allocation51_spill] sm:$0xff] %v3846_v36  ;;  %v1156_v11 = vmul.f32 %v3843_v28, %v3843_v28  ;;  %v1157_v40 = vmul.f32 %v3846_v36, %v3846_v36 }
 0x24d   : > { %v1238_v13 = vadd.f32 %v1155_v20, %v1154_v51  ;;  %v989_v46 = vpop.xlane.xlu0 %988  ;;  %v3866_v51 = vpop.f32.mrb[20].mxu1 }
 0x24e   : > { %v1040_v32 = vmul.f32 0.00390625, %v989_v46  ;;  %v1241_v63 = vadd.f32 %v1157_v40, %v1156_v11  ;;  %v3868_v20 = vpop.f32.mrb[21].mxu1 }
 0x24f   : > { %1239 = vadd.xlane.f32.xlu0 %v1238_v13  ;;  %v992_v44 = vpop.xlane.xlu1 %991 }
 0x250   : > { %v3861_v2 = vsub.f32 %v3520_v41, %v1040_v32  ;;  %v3864_v17 = vsub.f32 %v3523_v57, %v1040_v32  ;;  %v1041_v37 = vmul.f32 0.00390625, %v992_v44  ;;  %1242 = vadd.xlane.f32.xlu1 %v1241_v63  ;;  %v3880_v57 = vpop.f32.mrb[22].mxu1 }
 0x252   : > { %4811 = vst [vmem:[#allocation52_spill] sm:$0xff] %v3861_v2  ;;  %4812 = vst [vmem:[#allocation53_spill] sm:$0xff] %v3864_v17  ;;  %v3871_v28 = vsub.f32 %v3526_v55, %v1041_v37  ;;  %v3874_v46 = vsub.f32 %v3529_v8, %v1041_v37  ;;  %v1158_v13 = vmul.f32 %v3861_v2, %v3861_v2  ;;  %v3886_v55 = vpop.f32.mrb[23].mxu1 }
 0x253   : > { %v1159_v41 = vmul.f32 %v3864_v17, %v3864_v17  ;;  %v4816_v17 = vld [vmem:[#allocation14_spill] sm:$0xff] }
 0x254   : > { %4813 = vst [vmem:[#allocation54_spill] sm:$0xff] %v3871_v28  ;;  %4814 = vst [vmem:[#allocation55_spill] sm:$0xff] %v3874_v46  ;;  %v1160_v40 = vmul.f32 %v3871_v28, %v3871_v28  ;;  %v1161_v32 = vmul.f32 %v3874_v46, %v3874_v46 }
 0x255   : > { %v1244_v11 = vadd.f32 %v1159_v41, %v1158_v13  ;;  %v995_v63 = vpop.xlane.xlu0 %994  ;;  %v4818_v41 = vld [vmem:[#allocation15_spill] sm:$0xff] }
 0x256   : > { %v1042_v8 = vmul.f32 0.00390625, %v995_v63  ;;  %v1247_v37 = vadd.f32 %v1161_v32, %v1160_v40  ;;  %v3904_v40 = vpop.f32.mrb[24].mxu1 }
 0x257   : > { %1245 = vadd.xlane.f32.xlu0 %v1244_v11  ;;  %v998_v44 = vpop.xlane.xlu1 %997 }
 0x258   : > { %v3889_v2 = vsub.f32 %v3537_v15, %v1042_v8  ;;  %v3892_v36 = vsub.f32 %v4816_v17, %v1042_v8  ;;  %v1043_v13 = vmul.f32 0.00390625, %v998_v44  ;;  %1248 = vadd.xlane.f32.xlu1 %v1247_v37  ;;  %v3906_v15 = vpop.f32.mrb[25].mxu1 }
 0x259   : > { %4822 = vst [vmem:[#allocation57_spill] sm:$0xff] %v3906_v15  ;;  %v3912_v37 = vpop.f32.mrb[26].mxu1 }
 0x25a   : > { %4815 = vst [vmem:[#allocation56_spill] sm:$0xff] %v3889_v2  ;;  %4817 = vst [vmem:[#allocation14_spill] sm:$0xff] %v3892_v36  ;;  %v3895_v28 = vsub.f32 %v4818_v41, %v1043_v13  ;;  %v3898_v46 = vsub.f32 %v4820_v50, %v1043_v13  ;;  %v1162_v63 = vmul.f32 %v3889_v2, %v3889_v2  ;;  %v3914_v44 = vpop.f32.mrb[27].mxu1  ;;  %v4825_v2 = vld [vmem:[#allocation17_spill] sm:$0xff] }
 0x25b   : > { %v1163_v11 = vmul.f32 %v3892_v36, %v3892_v36  ;;  %4823 = vst [vmem:[#allocation58_spill] sm:$0xff] %v3912_v37  ;;  %4824 = vst [vmem:[#allocation59_spill] sm:$0xff] %v3914_v44 }
 0x25c   : > { %4819 = vst [vmem:[#allocation15_spill] sm:$0xff] %v3895_v28  ;;  %4821 = vst [vmem:[#allocation16_spill] sm:$0xff] %v3898_v46  ;;  %v1164_v32 = vmul.f32 %v3895_v28, %v3895_v28  ;;  %v1165_v8 = vmul.f32 %v3898_v46, %v3898_v46  ;;  %v4829_v28 = vld [vmem:[#allocation19_spill] sm:$0xff]  ;;  %v4831_v46 = vld [vmem:[#allocation20_spill] sm:$0xff] }
 0x25d   : > { %v1250_v17 = vadd.f32 %v1163_v11, %v1162_v63  ;;  %v1001_v50 = vpop.xlane.xlu0 %1000 }
 0x25e   : > { %v1044_v13 = vmul.f32 0.00390625, %v1001_v50  ;;  %v1253_v41 = vadd.f32 %v1165_v8, %v1164_v32  ;;  %v3936_v8 = vpop.f32.mrb[28].mxu1 }
 0x25f   : > { %1251 = vadd.xlane.f32.xlu0 %v1250_v17  ;;  %v1004_v36 = vpop.xlane.xlu1 %1003  ;;  %4833 = vst [vmem:[#allocation60_spill] sm:$0xff] %v3936_v8 }
 0x260   : > { %v3917_v22 = vsub.f32 %v4825_v2, %v1044_v13  ;;  %v3920_v63 = vsub.f32 %v4827_v34, %v1044_v13  ;;  %v1045_v11 = vmul.f32 0.00390625, %v1004_v36  ;;  %1254 = vadd.xlane.f32.xlu1 %v1253_v41  ;;  %v3938_v13 = vpop.f32.mrb[29].mxu1 }
 0x261   : > { %4834 = vst [vmem:[#allocation61_spill] sm:$0xff] %v3938_v13 }
 0x262   : > { %4826 = vst [vmem:[#allocation17_spill] sm:$0xff] %v3917_v22  ;;  %4828 = vst [vmem:[#allocation18_spill] sm:$0xff] %v3920_v63  ;;  %v3923_v15 = vsub.f32 %v4829_v28, %v1045_v11  ;;  %v3926_v37 = vsub.f32 %v4831_v46, %v1045_v11  ;;  %v1166_v50 = vmul.f32 %v3917_v22, %v3917_v22  ;;  %v3940_v11 = vpop.f32.mrb[30].mxu1  ;;  %v4840_v22 = vld [vmem:[#allocation22_spill] sm:$0xff] }
 0x263   : > { %v1167_v17 = vmul.f32 %v3920_v63, %v3920_v63  ;;  %4835 = vst [vmem:[#allocation62_spill] sm:$0xff] %v3940_v11 }
 0x264   : > { %4830 = vst [vmem:[#allocation19_spill] sm:$0xff] %v3923_v15  ;;  %4832 = vst [vmem:[#allocation20_spill] sm:$0xff] %v3926_v37  ;;  %v1168_v2 = vmul.f32 %v3923_v15, %v3923_v15  ;;  %v1169_v34 = vmul.f32 %v3926_v37, %v3926_v37  ;;  %v3948_v37 = vpop.f32.mrb[31].mxu1 }
 0x265   : > { %v1256_v32 = vadd.f32 %v1167_v17, %v1166_v50  ;;  %v1007_v36 = vpop.xlane.xlu0 %1006  ;;  %v4837_v50 = vld [vmem:[#allocation21_spill] sm:$0xff]  ;;  %4839 = vst [vmem:[#allocation64_spill] sm:$0xff] %v3948_v37 }
 0x266   : > { %v1046_v28 = vmul.f32 0.00390625, %v1007_v36  ;;  %v1259_v46 = vadd.f32 %v1169_v34, %v1168_v2 }
 0x267   : > { %1257 = vadd.xlane.f32.xlu0 %v1256_v32  ;;  %v1010_v41 = vpop.xlane.xlu1 %1009  ;;  %v4842_v32 = vld [vmem:[#allocation23_spill] sm:$0xff] }
 0x268   : > { %v3943_v63 = vsub.f32 %v3569_v49, %v1046_v28  ;;  %v3946_v17 = vsub.f32 %v4837_v50, %v1046_v28  ;;  %v1047_v15 = vmul.f32 0.00390625, %v1010_v41  ;;  %1260 = vadd.xlane.f32.xlu1 %v1259_v46 }
 0x26a   : > { %4836 = vst [vmem:[#allocation63_spill] sm:$0xff] %v3943_v63  ;;  %4838 = vst [vmem:[#allocation21_spill] sm:$0xff] %v3946_v17  ;;  %v3951_v8 = vsub.f32 %v4840_v22, %v1047_v15  ;;  %v3954_v2 = vsub.f32 %v4842_v32, %v1047_v15  ;;  %v1170_v34 = vmul.f32 %v3943_v63, %v3943_v63 }
 0x26b   : > { %v1171_v49 = vmul.f32 %v3946_v17, %v3946_v17 }
 0x26c   : > { %4841 = vst [vmem:[#allocation22_spill] sm:$0xff] %v3951_v8  ;;  %4843 = vst [vmem:[#allocation23_spill] sm:$0xff] %v3954_v2  ;;  %v1172_v28 = vmul.f32 %v3951_v8, %v3951_v8  ;;  %v1173_v46 = vmul.f32 %v3954_v2, %v3954_v2  ;;  %v4849_v2 = vld [vmem:[#allocation24_spill] sm:$0xff] }
 0x26d   : > { %v1262_v36 = vadd.f32 %v1171_v49, %v1170_v34  ;;  %v1013_v41 = vpop.xlane.xlu0 %1012  ;;  %v3970_v34 = vpop.f32.mrb[32].mxu1 }
 0x26e   : > { %v1048_v50 = vmul.f32 0.00390625, %v1013_v41  ;;  %v1265_v22 = vadd.f32 %v1173_v46, %v1172_v28  ;;  %4846 = vst [vmem:[#allocation67_spill] sm:$0xff] %v3970_v34  ;;  %v3972_v49 = vpop.f32.mrb[33].mxu1 }
 0x26f   : > { %1263 = vadd.xlane.f32.xlu0 %v1262_v36  ;;  %v1016_v37 = vpop.xlane.xlu1 %1015  ;;  %4847 = vst [vmem:[#allocation68_spill] sm:$0xff] %v3972_v49 }
 0x270   : > { %v3965_v15 = vsub.f32 %v3585_v62, %v1048_v50  ;;  %v3968_v32 = vsub.f32 %v3588_v43, %v1048_v50  ;;  %v1049_v63 = vmul.f32 0.00390625, %v1016_v37  ;;  %1266 = vadd.xlane.f32.xlu1 %v1265_v22  ;;  %v3984_v43 = vpop.f32.mrb[34].mxu1 }
 0x271   : > { %4851 = vst [vmem:[#allocation70_spill] sm:$0xff] %v3984_v43  ;;  %v4866_v43 = vld [vmem:[#allocation12_spill] sm:$0xff] }
 0x272   : > { %4844 = vst [vmem:[#allocation65_spill] sm:$0xff] %v3965_v15  ;;  %4845 = vst [vmem:[#allocation66_spill] sm:$0xff] %v3968_v32  ;;  %v3975_v8 = vsub.f32 %v3591_v58, %v1049_v63  ;;  %v3978_v41 = vsub.f32 %v4849_v2, %v1049_v63  ;;  %v1174_v36 = vmul.f32 %v3965_v15, %v3965_v15  ;;  %v3990_v58 = vpop.f32.mrb[35].mxu1 }
 0x273   : > { %v1175_v62 = vmul.f32 %v3968_v32, %v3968_v32  ;;  %4852 = vst [vmem:[#allocation71_spill] sm:$0xff] %v3990_v58  ;;  %v3992_v2 = vpop.f32.mrb[36].mxu1 }
 0x274   : > { %4848 = vst [vmem:[#allocation69_spill] sm:$0xff] %v3975_v8  ;;  %4850 = vst [vmem:[#allocation24_spill] sm:$0xff] %v3978_v41  ;;  %v1176_v28 = vmul.f32 %v3975_v8, %v3975_v8  ;;  %v1177_v46 = vmul.f32 %v3978_v41, %v3978_v41  ;;  %v3994_v50 = vpop.f32.mrb[37].mxu1 }
 0x275   : > { %v1268_v37 = vadd.f32 %v1175_v62, %v1174_v36  ;;  %4853 = vst [vmem:[#allocation72_spill] sm:$0xff] %v3992_v2  ;;  %4854 = vst [vmem:[#allocation73_spill] sm:$0xff] %v3994_v50  ;;  %v3996_v22 = vpop.f32.mrb[38].mxu1 }
 0x276   : > { %v1271_v63 = vadd.f32 %v1177_v46, %v1176_v28  ;;  %4855 = vst [vmem:[#allocation74_spill] sm:$0xff] %v3996_v22  ;;  %v3998_v32 = vpop.f32.mrb[39].mxu1 }
 0x277   : > { %1269 = vadd.xlane.f32.xlu0 %v1268_v37  ;;  %4856 = vst [vmem:[#allocation75_spill] sm:$0xff] %v3998_v32  ;;  %v4000_v36 = vpop.f32.mrb[40].mxu1 }
 0x278   : > { %1272 = vadd.xlane.f32.xlu1 %v1271_v63  ;;  %4857 = vst [vmem:[#allocation76_spill] sm:$0xff] %v4000_v36  ;;  %v4002_v62 = vpop.f32.mrb[41].mxu1 }
 0x279   : > { %4858 = vst [vmem:[#allocation77_spill] sm:$0xff] %v4002_v62  ;;  %v4004_v8 = vpop.f32.mrb[42].mxu1 }
 0x27a   : > { %4859 = vst [vmem:[#allocation78_spill] sm:$0xff] %v4004_v8  ;;  %v4006_v41 = vpop.f32.mrb[43].mxu1 }
 0x27b   : > { %4860 = vst [vmem:[#allocation79_spill] sm:$0xff] %v4006_v41  ;;  %v4008_v46 = vpop.f32.mrb[44].mxu1  ;;  %v1435_v41 = vld [vmem:[#allocation7 + $0x1] ss:$4 sm:$0x3] }
 0x27c   : > { %4861 = vst [vmem:[#allocation80_spill] sm:$0xff] %v4008_v46  ;;  %v4010_v17 = vpop.f32.mrb[45].mxu1 }
 0x27d   : > { %4862 = vst [vmem:[#allocation81_spill] sm:$0xff] %v4010_v17  ;;  %v4012_v32 = vpop.f32.mrb[46].mxu1  ;;  %v4019_v17 = vrot.slane %v1435_v41, %v4866_v43 }
 0x27e   : > { %4863 = vst [vmem:[#allocation82_spill] sm:$0xff] %v4012_v32  ;;  %v4014_v2 = vpop.f32.mrb[47].mxu1 }
 0x27f   : > { %4864 = vst [vmem:[#allocation83_spill] sm:$0xff] %v4014_v2  ;;  %v4016_v46 = vpop.f32.mrb[48].mxu1 }
 0x280   : > { %4865 = vst [vmem:[#allocation84_spill] sm:$0xff] %v4016_v46 }
 0x28b   : > { %v1180_v15 = vpop.xlane.xlu0 %1179 }
 0x28c   : > { %v1274_v37 = vmul.f32 0.00390625, %v1180_v15 }
 0x28e   : > { %v1306_v28 = vadd.f32 1e-05, %v1274_v37  ;;  %v1512_v37 = vld [vmem:[#allocation7 + $0x2] ss:$4 sm:$0x3] }
 0x28f   : > { %v1183_v63 = vpop.xlane.xlu1 %1182 }
 0x290   : > { %2511 = vrsqrt.f32 %v1306_v28  ;;  %v1275_v22 = vmul.f32 0.00390625, %v1183_v63  ;;  %v4867_v28 = vld [vmem:[#allocation13_spill] sm:$0xff]  ;;  %v4024_v63 = vpop.f32.mrb[49].mxu1 }
 0x291   : > { %4868 = vst [vmem:[#allocation12_spill] sm:$0xff] %v4024_v63  ;;  %v4034_v34 = vrot.slane %v1512_v37, %v4867_v28 }
 0x292   : > { %v1307_v50 = vadd.f32 1e-05, %v1275_v22  ;;  %v4022_v22 = vrot.slane %v1435_v41, %v4867_v28 }
 0x293   : > { %v1186_v36 = vpop.xlane.xlu0 %1185 }
 0x294   : > { %2513 = vrsqrt.f32 %v1307_v50  ;;  %v1276_v8 = vmul.f32 0.00390625, %v1186_v36  ;;  %v4026_v50 = vpop.f32.mrb[50].mxu1  ;;  %v4870_v36 = vld [vmem:[#allocation25_spill] sm:$0xff] }
 0x295   : > { %4869 = vst [vmem:[#allocation13_spill] sm:$0xff] %v4026_v50  ;;  %v4036_v11 = vpop.f32.mrb[51].mxu1 }
 0x296   : > { %v1308_v62 = vadd.f32 1e-05, %v1276_v8 }
 0x297   : > { %v1189_v58 = vpop.xlane.xlu1 %1188 }
 0x298   : > { %2515 = vrsqrt.f32 %v1308_v62  ;;  %v1277_v15 = vmul.f32 0.00390625, %v1189_v58  ;;  %v4030_v58 = vrot.slane %v1512_v37, %v4866_v43  ;;  %v4871_v62 = vld [vmem:[#allocation26_spill] sm:$0xff] }
 0x29a   : > { %v2512_v32 = vpop.eup %2511  ;;  %v1309_v2 = vadd.f32 1e-05, %v1277_v15 }
 0x29b   : > { %v1192_v8 = vpop.xlane.xlu0 %1191  ;;  %v1370_v49 = vmul.f32 %v2512_v32, %v4870_v36  ;;  %v1371_v46 = vmul.f32 %v2512_v32, %v4871_v62 }
 0x29c   : > { %2517 = vrsqrt.f32 %v1309_v2  ;;  %v1278_v41 = vmul.f32 0.00390625, %v1192_v8  ;;  %v4052_v8 = vpop.f32.mrb[52].mxu1 }
 0x29d   : > { %v1447_v63 = vmul.f32 %v4019_v17, %v1370_v49  ;;  %v1448_v15 = vmul.f32 %v4022_v22, %v1371_v46  ;;  %v1195_v50 = vpop.xlane.xlu1 %1194  ;;  %v4054_v62 = vpop.f32.mrb[53].mxu1 }
 0x29e   : > { %v2514_v13 = vpop.eup %2513  ;;  %v1310_v44 = vadd.f32 1e-05, %v1278_v41  ;;  %v1279_v36 = vmul.f32 0.00390625, %v1195_v50 }
 0x29f   : > { %v1524_v43 = vadd.f32 %v4030_v58, %v1447_v63  ;;  %v1525_v12 = vadd.f32 %v4034_v34, %v1448_v15  ;;  %v1372_v32 = vmul.f32 %v2514_v13, %v3611_v1  ;;  %v1373_v37 = vmul.f32 %v2514_v13, %v3614_v4  ;;  %v4062_v15 = vpop.f32.mrb[54].mxu1 }
 0x2a0   : > { %2519 = vrsqrt.f32 %v1310_v44  ;;  %v1311_v28 = vadd.f32 1e-05, %v1279_v36 }
 0x2a1   : > { %v4045_v2 = vadd.f32 %v1524_v43, %v3700_v5  ;;  %v4048_v49 = vadd.f32 %v1525_v12, %v3702_v25  ;;  %v1449_v46 = vmul.f32 %v4019_v17, %v1372_v32  ;;  %v1450_v50 = vmul.f32 %v4022_v22, %v1373_v37 }
 0x2a2   : > { %v2516_v63 = vpop.eup %2515  ;;  %2521 = vrsqrt.f32 %v1311_v28 }
 0x2a3   : > { %v2316_v1 = vmul.f32 -1.442695, %v4045_v2  ;;  %v2317_v4 = vmul.f32 -1.442695, %v4048_v49  ;;  %v1526_v5 = vadd.f32 %v4030_v58, %v1449_v46  ;;  %v1527_v44 = vadd.f32 %v4034_v34, %v1450_v50  ;;  %v1198_v25 = vpop.xlane.xlu0 %1197 }
 0x2a4   : > { %v1280_v12 = vmul.f32 0.00390625, %v1198_v25  ;;  %v1374_v13 = vmul.f32 %v2516_v63, %v3621_v48  ;;  %v1375_v41 = vmul.f32 %v2516_v63, %v3624_v26  ;;  %v4072_v48 = vpop.f32.mrb[55].mxu1 }
 0x2a5   : > { %2523 = vpow2.f32 %v2316_v1  ;;  %v4065_v36 = vadd.f32 %v1526_v5, %v3704_v59  ;;  %v4068_v43 = vadd.f32 %v1527_v44, %v3712_v39  ;;  %v1201_v32 = vpop.xlane.xlu1 %1200 }
 0x2a6   : > { %v2518_v37 = vpop.eup %2517  ;;  %2525 = vpow2.f32 %v2317_v4  ;;  %v1312_v28 = vadd.f32 1e-05, %v1280_v12  ;;  %v1451_v46 = vmul.f32 %v4019_v17, %v1374_v13  ;;  %v1452_v50 = vmul.f32 %v4022_v22, %v1375_v41 }
 0x2a7   : > { %v2318_v26 = vmul.f32 -1.442695, %v4065_v36  ;;  %v2319_v63 = vmul.f32 -1.442695, %v4068_v43  ;;  %v1281_v1 = vmul.f32 0.00390625, %v1201_v32  ;;  %v1376_v59 = vmul.f32 %v2518_v37, %v3631_v0 }
 0x2a8   : > { %2527 = vrsqrt.f32 %v1312_v28  ;;  %v1528_v39 = vadd.f32 %v4030_v58, %v1451_v46  ;;  %v1529_v5 = vadd.f32 %v4034_v34, %v1452_v50  ;;  %v1377_v4 = vmul.f32 %v2518_v37, %v3634_v61 }
 0x2a9   : > { %2529 = vpow2.f32 %v2318_v26  ;;  %v1313_v44 = vadd.f32 1e-05, %v1281_v1  ;;  %v1453_v25 = vmul.f32 %v4019_v17, %v1376_v59 }
 0x2aa   : > { %v2520_v12 = vpop.eup %2519  ;;  %2531 = vpow2.f32 %v2319_v63  ;;  %v4082_v13 = vadd.f32 %v1528_v39, %v3728_v42  ;;  %v4085_v41 = vadd.f32 %v1529_v5, %v3730_v7  ;;  %v1454_v0 = vmul.f32 %v4022_v22, %v1377_v4 }
 0x2ab   : > { %2533 = vrsqrt.f32 %v1313_v44  ;;  %v1530_v32 = vadd.f32 %v4030_v58, %v1453_v25  ;;  %v1204_v28 = vpop.xlane.xlu0 %1203  ;;  %v1378_v61 = vmul.f32 %v2520_v12, %v3641_v23  ;;  %v1379_v37 = vmul.f32 %v2520_v12, %v3644_v47 }
 0x2ac   : > { %v2522_v46 = vpop.eup %2521  ;;  %v2320_v50 = vmul.f32 -1.442695, %v4082_v13  ;;  %v2321_v26 = vmul.f32 -1.442695, %v4085_v41  ;;  %v1531_v42 = vadd.f32 %v4034_v34, %v1454_v0  ;;  %v1282_v63 = vmul.f32 0.00390625, %v1204_v28  ;;  %v4106_v0 = vpop.f32.mrb[56].mxu1 }
 0x2ad   : > { %v4095_v7 = vadd.f32 %v1530_v32, %v3738_v33  ;;  %v1455_v1 = vmul.f32 %v4019_v17, %v1378_v61  ;;  %v1456_v59 = vmul.f32 %v4022_v22, %v1379_v37  ;;  %v1207_v39 = vpop.xlane.xlu1 %1206  ;;  %v1380_v23 = vmul.f32 %v2522_v46, %v3647_v35  ;;  %v4109_v61 = vpop.f32.mrb[57].mxu1 }
 0x2ae   : > { %2535 = vpow2.f32 %v2320_v50  ;;  %v4101_v47 = vadd.f32 %v1531_v42, %v3740_v16  ;;  %v1314_v5 = vadd.f32 1e-05, %v1282_v63  ;;  %v1283_v4 = vmul.f32 0.00390625, %v1207_v39 }
 0x2af   : > { %v2524_v44 = vpop.eup %2523  ;;  %2537 = vpow2.f32 %v2321_v26  ;;  %v2322_v25 = vmul.f32 -1.442695, %v4095_v7  ;;  %v1532_v33 = vadd.f32 %v4030_v58, %v1455_v1  ;;  %v1533_v12 = vadd.f32 %v4034_v34, %v1456_v59  ;;  %v4117_v26 = vpop.f32.mrb[58].mxu1 }
 0x2b0   : > { %v2526_v32 = vpop.eup %2525  ;;  %v1844_v28 = vadd.f32 1.0, %v2524_v44  ;;  %v2323_v35 = vmul.f32 -1.442695, %v4101_v47  ;;  %2539 = vrsqrt.f32 %v1314_v5  ;;  %v1315_v63 = vadd.f32 1e-05, %v1283_v4  ;;  %v4121_v39 = vpop.f32.mrb[59].mxu1 }
 0x2b1   : > { %v1845_v16 = vadd.f32 1.0, %v2526_v32  ;;  %2541 = vpow2.f32 %v2322_v25  ;;  %v4112_v37 = vadd.f32 %v1532_v33, %v3756_v60  ;;  %v4115_v50 = vadd.f32 %v1533_v12, %v3764_v45  ;;  %4872 = vst [vmem:[#allocation25_spill] sm:$0xff] %v4121_v39 }
 0x2b2   : > { %v2528_v42 = vpop.eup %2527  ;;  %2543 = vrcp.f32 %v1844_v28  ;;  %v1457_v1 = vmul.f32 %v4019_v17, %v1380_v23  ;;  %v1381_v59 = vmul.f32 %v2522_v46, %v3650_v24 }
 0x2b3   : > { %v2530_v5 = vpop.eup %2529  ;;  %2545 = vrcp.f32 %v1845_v16  ;;  %v2324_v44 = vmul.f32 -1.442695, %v4112_v37  ;;  %v2325_v60 = vmul.f32 -1.442695, %v4115_v50  ;;  %v1382_v45 = vmul.f32 %v2528_v42, %v3661_v21 }
 0x2b4   : > { %v1210_v25 = vpop.xlane.xlu0 %1209  ;;  %v2532_v33 = vpop.eup %2531  ;;  %v1846_v12 = vadd.f32 1.0, %v2530_v5  ;;  %2547 = vpow2.f32 %v2323_v35  ;;  %v1534_v4 = vadd.f32 %v4030_v58, %v1457_v1  ;;  %v1458_v23 = vmul.f32 %v4022_v22, %v1381_v59 }
 0x2b5   : > { %v2534_v32 = vpop.eup %2533  ;;  %v1847_v24 = vadd.f32 1.0, %v2532_v33  ;;  %2549 = vpow2.f32 %v2324_v44  ;;  %v1284_v46 = vmul.f32 0.00390625, %v1210_v25  ;;  %v1459_v28 = vmul.f32 %v4019_v17, %v1382_v45  ;;  %v1213_v16 = vpop.xlane.xlu1 %1212 }
 0x2b6   : > { %2551 = vrcp.f32 %v1846_v12  ;;  %v4130_v39 = vadd.f32 %v1534_v4, %v3780_v54  ;;  %v1535_v21 = vadd.f32 %v4034_v34, %v1458_v23  ;;  %v1383_v35 = vmul.f32 %v2528_v42, %v3664_v29  ;;  %v4135_v33 = vpop.f32.mrb[60].mxu1 }
 0x2b7   : > { %2553 = vrcp.f32 %v1847_v24  ;;  %v1316_v1 = vadd.f32 1e-05, %v1284_v46  ;;  %v1536_v59 = vadd.f32 %v4030_v58, %v1459_v28  ;;  %v1285_v5 = vmul.f32 0.00390625, %v1213_v16  ;;  %v4142_v12 = vpop.f32.mrb[61].mxu1 }
 0x2b8   : > { %v2536_v44 = vpop.eup %2535  ;;  %2555 = vpow2.f32 %v2325_v60  ;;  %v2326_v25 = vmul.f32 -1.442695, %v4130_v39  ;;  %v4139_v45 = vadd.f32 %v1535_v21, %v3782_v56  ;;  %v1460_v54 = vmul.f32 %v4022_v22, %v1383_v35  ;;  %v4148_v24 = vpop.f32.mrb[62].mxu1 }
 0x2b9   : > { %v2538_v4 = vpop.eup %2537  ;;  %v1848_v29 = vadd.f32 1.0, %v2536_v44  ;;  %2557 = vrsqrt.f32 %v1315_v63  ;;  %v4146_v42 = vadd.f32 %v1536_v59, %v3800_v18  ;;  %v1317_v23 = vadd.f32 1e-05, %v1285_v5  ;;  %4873 = vst [vmem:[#allocation26_spill] sm:$0xff] %v4148_v24  ;;  %v4152_v16 = vpop.f32.mrb[63].mxu1 }
 0x2ba   : > { %v2540_v60 = vpop.eup %2539  ;;  %v1849_v46 = vadd.f32 1.0, %v2538_v4  ;;  %2559 = vpow2.f32 %v2326_v25  ;;  %v2327_v56 = vmul.f32 -1.442695, %v4139_v45  ;;  %v1537_v28 = vadd.f32 %v4034_v34, %v1460_v54  ;;  %4874 = vst [vmem:[#allocation85_spill] sm:$0xff] %v4152_v16 }
 0x2bb   : > { %v2542_v21 = vpop.eup %2541  ;;  %2561 = vrcp.f32 %v1848_v29  ;;  %v2328_v35 = vmul.f32 -1.442695, %v4146_v42  ;;  %v1384_v63 = vmul.f32 %v2534_v32, %v3667_v31  ;;  %v1385_v18 = vmul.f32 %v2534_v32, %v3670_v19  ;;  %v1216_v59 = vpop.xlane.xlu0 %1215 }
 0x2bc   : > { %v2544_v5 = vpop.eup %2543  ;;  %2563 = vrcp.f32 %v1849_v46  ;;  %v1850_v44 = vadd.f32 1.0, %v2542_v21  ;;  %v4158_v25 = vadd.f32 %v1537_v28, %v3806_v27  ;;  %v1286_v4 = vmul.f32 0.00390625, %v1216_v59 }
 0x2bd   : > { %v2546_v54 = vpop.eup %2545  ;;  %v2036_v16 = vmul.f32 %v2544_v5, %v4045_v2  ;;  %2565 = vpow2.f32 %v2327_v56  ;;  %v1461_v29 = vmul.f32 %v4019_v17, %v1384_v63  ;;  %v1462_v24 = vmul.f32 %v4022_v22, %v1385_v18 }
 0x2be   : > { %v2548_v31 = vpop.eup %2547  ;;  %v2037_v19 = vmul.f32 %v2546_v54, %v4048_v49  ;;  %2567 = vrcp.f32 %v1850_v44  ;;  %v2329_v32 = vmul.f32 -1.442695, %v4158_v25  ;;  %v1318_v46 = vadd.f32 1e-05, %v1286_v4 }
 0x2bf   : > { %v2550_v21 = vpop.eup %2549  ;;  %2100 = vst [vmem:[%s4167_s20] sm:$0xff] %v2036_v16  ;;  %v1851_v27 = vadd.f32 1.0, %v2548_v31  ;;  %2569 = vrsqrt.f32 %v1316_v1  ;;  %v1538_v2 = vadd.f32 %v4030_v58, %v1461_v29  ;;  %v1539_v56 = vadd.f32 %v4034_v34, %v1462_v24  ;;  %v1219_v24 = vpop.xlane.xlu1 %1218 }
 0x2c0   : > { %v2552_v28 = vpop.eup %2551  ;;  %2101 = vst [vmem:[%s4167_s20 + $0x8] sm:$0xff] %v2037_v19  ;;  %v1852_v49 = vadd.f32 1.0, %v2550_v21  ;;  %2571 = vpow2.f32 %v2328_v35  ;;  %v1386_v63 = vmul.f32 %v2540_v60, %v3681_v9  ;;  %v1387_v18 = vmul.f32 %v2540_v60, %v3684_v52  ;;  %v4875_v21 = vld [vmem:[#allocation27_spill] sm:$0xff] }
 0x2c1   : > { %v2554_v59 = vpop.eup %2553  ;;  %v2038_v5 = vmul.f32 %v2552_v28, %v4065_v36  ;;  %2573 = vrcp.f32 %v1851_v27  ;;  %v4177_v1 = vadd.f32 %v1538_v2, %v3814_v6  ;;  %v4180_v16 = vadd.f32 %v1539_v56, %v3816_v53  ;;  %v4876_v2 = vld [vmem:[#allocation28_spill] sm:$0xff] }
 0x2c2   : > { %v2556_v44 = vpop.eup %2555  ;;  %v2039_v4 = vmul.f32 %v2554_v59, %v4068_v43  ;;  %2575 = vrcp.f32 %v1852_v49  ;;  %v1463_v9 = vmul.f32 %v4019_v17, %v1386_v63  ;;  %v1464_v52 = vmul.f32 %v4022_v22, %v1387_v18 }
 0x2c3   : > { %v2558_v60 = vpop.eup %2557  ;;  %2102 = vst [vmem:[%s4167_s20 + $0x10] sm:$0xff] %v2038_v5  ;;  %v1853_v36 = vadd.f32 1.0, %v2556_v44  ;;  %2577 = vpow2.f32 %v2329_v32  ;;  %v2330_v35 = vmul.f32 -1.442695, %v4177_v1  ;;  %v2331_v6 = vmul.f32 -1.442695, %v4180_v16 }
 0x2c4   : > { %v2560_v54 = vpop.eup %2559  ;;  %2103 = vst [vmem:[%s4167_s20 + $0x18] sm:$0xff] %v2039_v4  ;;  %2579 = vrsqrt.f32 %v1317_v23  ;;  %v1540_v53 = vadd.f32 %v4030_v58, %v1463_v9  ;;  %v1541_v43 = vadd.f32 %v4034_v34, %v1464_v52  ;;  %v1287_v29 = vmul.f32 0.00390625, %v1219_v24  ;;  %v1222_v24 = vpop.xlane.xlu0 %1221 }
 0x2c5   : > { %v2562_v31 = vpop.eup %2561  ;;  %2581 = vrcp.f32 %v1853_v36  ;;  %v1854_v19 = vadd.f32 1.0, %v2560_v54  ;;  %v1388_v27 = vmul.f32 %v2558_v60, %v4875_v21  ;;  %v1389_v32 = vmul.f32 %v2558_v60, %v4876_v2  ;;  %v1225_v2 = vpop.xlane.xlu1 %1224 }
 0x2c6   : > { %v2564_v56 = vpop.eup %2563  ;;  %v2040_v28 = vmul.f32 %v2562_v31, %v4082_v13  ;;  %2583 = vpow2.f32 %v2330_v35  ;;  %v4195_v23 = vadd.f32 %v1540_v53, %v3832_v30  ;;  %v4198_v49 = vadd.f32 %v1541_v43, %v3834_v14  ;;  %v4877_v35 = vld [vmem:[#allocation29_spill] sm:$0xff]  ;;  %v4878_v53 = vld [vmem:[#allocation30_spill] sm:$0xff] }
 0x2c7   : > { %v2566_v63 = vpop.eup %2565  ;;  %v2041_v18 = vmul.f32 %v2564_v56, %v4085_v41  ;;  %2585 = vrcp.f32 %v1854_v19  ;;  %v1319_v59 = vadd.f32 1e-05, %v1287_v29  ;;  %v1465_v5 = vmul.f32 %v4019_v17, %v1388_v27 }
 0x2c8   : > { %v2568_v44 = vpop.eup %2567  ;;  %2104 = vst [vmem:[%s4167_s20 + $0x20] sm:$0xff] %v2040_v28  ;;  %v1855_v4 = vadd.f32 1.0, %v2566_v63  ;;  %2587 = vpow2.f32 %v2331_v6  ;;  %v2332_v13 = vmul.f32 -1.442695, %v4195_v23  ;;  %v2333_v30 = vmul.f32 -1.442695, %v4198_v49 }
 0x2c9   : > { %v2570_v9 = vpop.eup %2569  ;;  %2105 = vst [vmem:[%s4167_s20 + $0x28] sm:$0xff] %v2041_v18  ;;  %v2042_v14 = vmul.f32 %v2568_v44, %v4095_v7  ;;  %2589 = vrsqrt.f32 %v1318_v46  ;;  %v1542_v41 = vadd.f32 %v4030_v58, %v1465_v5  ;;  %v1466_v52 = vmul.f32 %v4022_v22, %v1389_v32 }
 0x2ca   : > { %v2572_v60 = vpop.eup %2571  ;;  %2591 = vrcp.f32 %v1855_v4  ;;  %v1288_v36 = vmul.f32 0.00390625, %v1222_v24  ;;  %v1390_v54 = vmul.f32 %v2570_v9, %v4877_v35  ;;  %v1391_v6 = vmul.f32 %v2570_v9, %v4878_v53  ;;  %v4879_v4 = vld [vmem:[#allocation31_spill] sm:$0xff] }
 0x2cb   : > { %v2574_v43 = vpop.eup %2573  ;;  %2106 = vst [vmem:[%s4167_s20 + $0x30] sm:$0xff] %v2042_v14  ;;  %v1856_v29 = vadd.f32 1.0, %v2572_v60  ;;  %2593 = vpow2.f32 %v2332_v13  ;;  %v4213_v31 = vadd.f32 %v1542_v41, %v3852_v38  ;;  %v1543_v7 = vadd.f32 %v4034_v34, %v1466_v52 }
 0x2cc   : > { %v2576_v46 = vpop.eup %2575  ;;  %v2043_v19 = vmul.f32 %v2574_v43, %v4101_v47  ;;  %2595 = vpow2.f32 %v2333_v30  ;;  %v1320_v21 = vadd.f32 1e-05, %v1288_v36  ;;  %v1467_v27 = vmul.f32 %v4019_v17, %v1390_v54  ;;  %v1228_v36 = vpop.xlane.xlu0 %1227 }
 0x2cd   : > { %v2578_v32 = vpop.eup %2577  ;;  %v2044_v56 = vmul.f32 %v2576_v46, %v4112_v37  ;;  %2597 = vrcp.f32 %v1856_v29  ;;  %v2334_v28 = vmul.f32 -1.442695, %v4213_v31  ;;  %v4221_v38 = vadd.f32 %v1543_v7, %v3854_v10  ;;  %v4880_v29 = vld [vmem:[#allocation32_spill] sm:$0xff] }
 0x2ce   : > { %v2580_v63 = vpop.eup %2579  ;;  %2107 = vst [vmem:[%s4167_s20 + $0x38] sm:$0xff] %v2043_v19  ;;  %v1857_v18 = vadd.f32 1.0, %v2578_v32  ;;  %2599 = vrsqrt.f32 %v1319_v59  ;;  %v1544_v47 = vadd.f32 %v4030_v58, %v1467_v27  ;;  %v1468_v5 = vmul.f32 %v4022_v22, %v1391_v6 }
 0x2cf   : > { %v2582_v24 = vpop.eup %2581  ;;  %2108 = vst [vmem:[%s4167_s20 + $0x40] sm:$0xff] %v2044_v56  ;;  %2601 = vpow2.f32 %v2334_v28  ;;  %v2335_v37 = vmul.f32 -1.442695, %v4221_v38  ;;  %v1289_v44 = vmul.f32 0.00390625, %v1225_v2  ;;  %v1392_v13 = vmul.f32 %v2580_v63, %v4879_v4 }
 0x2d0   : > { %v2584_v30 = vpop.eup %2583  ;;  %v2045_v10 = vmul.f32 %v2582_v24, %v4115_v50  ;;  %2603 = vrcp.f32 %v1857_v18  ;;  %v4231_v9 = vadd.f32 %v1544_v47, %v3866_v51  ;;  %v1545_v59 = vadd.f32 %v4034_v34, %v1468_v5  ;;  %v1231_v5 = vpop.xlane.xlu1 %1230 }
 0x2d1   : > { %v2586_v14 = vpop.eup %2585  ;;  %v1858_v41 = vadd.f32 1.0, %v2584_v30  ;;  %2605 = vpow2.f32 %v2335_v37  ;;  %v1321_v52 = vadd.f32 1e-05, %v1289_v44  ;;  %v1469_v60 = vmul.f32 %v4019_v17, %v1392_v13 }
 0x2d2   : > { %v2588_v35 = vpop.eup %2587  ;;  %2109 = vst [vmem:[%s4167_s20 + $0x48] sm:$0xff] %v2045_v10  ;;  %v2046_v54 = vmul.f32 %v2586_v14, %v4130_v39  ;;  %2607 = vrsqrt.f32 %v1320_v21  ;;  %v2336_v50 = vmul.f32 -1.442695, %v4231_v9  ;;  %v4239_v51 = vadd.f32 %v1545_v59, %v3868_v20  ;;  %v4881_v21 = vld [vmem:[#allocation33_spill] sm:$0xff] }
 0x2d3   : > { %v2590_v53 = vpop.eup %2589  ;;  %2609 = vrcp.f32 %v1858_v41  ;;  %v1859_v6 = vadd.f32 1.0, %v2588_v35  ;;  %v1546_v43 = vadd.f32 %v4030_v58, %v1469_v60  ;;  %v1393_v7 = vmul.f32 %v2580_v63, %v4880_v29  ;;  %v4882_v41 = vld [vmem:[#allocation34_spill] sm:$0xff] }
 0x2d4   : > { %v2592_v46 = vpop.eup %2591  ;;  %2110 = vst [vmem:[%s4167_s20 + $0x50] sm:$0xff] %v2046_v54  ;;  %2611 = vpow2.f32 %v2336_v50  ;;  %v2337_v19 = vmul.f32 -1.442695, %v4239_v51  ;;  %v1290_v39 = vmul.f32 0.00390625, %v1228_v36  ;;  %v1394_v27 = vmul.f32 %v2590_v53, %v4881_v21  ;;  %v1234_v54 = vpop.xlane.xlu0 %1233 }
 0x2d5   : > { %v2594_v2 = vpop.eup %2593  ;;  %v2047_v20 = vmul.f32 %v2592_v46, %v4139_v45  ;;  %2613 = vrcp.f32 %v1859_v6  ;;  %v4248_v32 = vadd.f32 %v1546_v43, %v3880_v57  ;;  %v1470_v56 = vmul.f32 %v4022_v22, %v1393_v7 }
 0x2d6   : > { %v2596_v28 = vpop.eup %2595  ;;  %v1860_v63 = vadd.f32 1.0, %v2594_v2  ;;  %2615 = vpow2.f32 %v2337_v19  ;;  %v1322_v18 = vadd.f32 1e-05, %v1290_v39  ;;  %v1471_v47 = vmul.f32 %v4019_v17, %v1394_v27  ;;  %v4883_v19 = vld [vmem:[#allocation35_spill] sm:$0xff]  ;;  %v4884_v2 = vld [vmem:[#allocation57_spill] sm:$0xff] }
 0x2d7   : > { %v2598_v24 = vpop.eup %2597  ;;  %2111 = vst [vmem:[%s4167_s20 + $0x58] sm:$0xff] %v2047_v20  ;;  %v1861_v37 = vadd.f32 1.0, %v2596_v28  ;;  %2617 = vrsqrt.f32 %v1321_v52  ;;  %v2338_v45 = vmul.f32 -1.442695, %v4248_v32  ;;  %v1547_v44 = vadd.f32 %v4034_v34, %v1470_v56  ;;  %v4885_v56 = vld [vmem:[#allocation36_spill] sm:$0xff] }
 0x2d8   : > { %v2600_v57 = vpop.eup %2599  ;;  %v2048_v4 = vmul.f32 %v2598_v24, %v4146_v42  ;;  %2619 = vrcp.f32 %v1860_v63  ;;  %v1548_v13 = vadd.f32 %v4030_v58, %v1471_v47  ;;  %v1395_v30 = vmul.f32 %v2590_v53, %v3736_v3  ;;  %v1237_v24 = vpop.xlane.xlu1 %1236 }
 0x2d9   : > { %v2602_v10 = vpop.eup %2601  ;;  %2621 = vrcp.f32 %v1861_v37  ;;  %v4259_v59 = vadd.f32 %v1547_v44, %v3886_v55  ;;  %v1291_v14 = vmul.f32 0.00390625, %v1231_v5  ;;  %v1396_v52 = vmul.f32 %v2600_v57, %v4882_v41 }
 0x2da   : > { %v2604_v60 = vpop.eup %2603  ;;  %2112 = vst [vmem:[%s4167_s20 + $0x60] sm:$0xff] %v2048_v4  ;;  %v1862_v36 = vadd.f32 1.0, %v2602_v10  ;;  %2623 = vpow2.f32 %v2338_v45  ;;  %v4264_v42 = vadd.f32 %v1548_v13, %v3904_v40  ;;  %v1472_v35 = vmul.f32 %v4022_v22, %v1395_v30  ;;  %v4886_v13 = vld [vmem:[#allocation58_spill] sm:$0xff] }
 0x2db   : > { %v2606_v3 = vpop.eup %2605  ;;  %v2049_v50 = vmul.f32 %v2604_v60, %v4158_v25  ;;  %v2339_v55 = vmul.f32 -1.442695, %v4259_v59  ;;  %2625 = vrsqrt.f32 %v1322_v18  ;;  %v1323_v53 = vadd.f32 1e-05, %v1291_v14 }
 0x2dc   : > { %v2608_v6 = vpop.eup %2607  ;;  %2627 = vrcp.f32 %v1862_v36  ;;  %v1863_v43 = vadd.f32 1.0, %v2606_v3  ;;  %v2340_v29 = vmul.f32 -1.442695, %v4264_v42  ;;  %v1549_v7 = vadd.f32 %v4034_v34, %v1472_v35  ;;  %v4888_v3 = vld [vmem:[#allocation59_spill] sm:$0xff] }
 0x2dd   : > { %v2610_v46 = vpop.eup %2609  ;;  %2113 = vst [vmem:[%s4167_s20 + $0x68] sm:$0xff] %v2049_v50  ;;  %2629 = vpow2.f32 %v2339_v55  ;;  %v1473_v40 = vmul.f32 %v4019_v17, %v1396_v52  ;;  %v1397_v39 = vmul.f32 %v2600_v57, %v4883_v19  ;;  %v1292_v25 = vmul.f32 0.00390625, %v1234_v54  ;;  %v4887_v52 = vld [vmem:[#allocation37_spill] sm:$0xff] }
 0x2de   : > { %v2612_v21 = vpop.eup %2611  ;;  %v2050_v27 = vmul.f32 %v2610_v46, %v4177_v1  ;;  %2631 = vrcp.f32 %v1863_v43  ;;  %v4276_v20 = vadd.f32 %v1549_v7, %v4884_v2  ;;  %v1398_v28 = vmul.f32 %v2608_v6, %v4885_v56  ;;  %v4891_v2 = vld [vmem:[#allocation39_spill] sm:$0xff] }
 0x2df   : > { %v2614_v63 = vpop.eup %2613  ;;  %v1864_v18 = vadd.f32 1.0, %v2612_v21  ;;  %2633 = vpow2.f32 %v2340_v29  ;;  %v1550_v47 = vadd.f32 %v4030_v58, %v1473_v40  ;;  %v1474_v5 = vmul.f32 %v4022_v22, %v1397_v39  ;;  %v4889_v39 = vld [vmem:[#allocation60_spill] sm:$0xff]  ;;  %v4890_v21 = vld [vmem:[#allocation38_spill] sm:$0xff] }
 0x2e0   : > { %v2616_v37 = vpop.eup %2615  ;;  %2114 = vst [vmem:[%s4167_s20 + $0x70] sm:$0xff] %v2050_v27  ;;  %v2051_v45 = vmul.f32 %v2614_v63, %v4180_v16  ;;  %v2341_v1 = vmul.f32 -1.442695, %v4276_v20  ;;  %2635 = vrsqrt.f32 %v1323_v53  ;;  %v1324_v44 = vadd.f32 1e-05, %v1292_v25 }
 0x2e1   : > { %v2618_v57 = vpop.eup %2617  ;;  %2637 = vrcp.f32 %v1864_v18  ;;  %v1865_v4 = vadd.f32 1.0, %v2616_v37  ;;  %v4285_v30 = vadd.f32 %v1550_v47, %v4886_v13  ;;  %v1551_v10 = vadd.f32 %v4034_v34, %v1474_v5  ;;  %v4892_v47 = vld [vmem:[#allocation40_spill] sm:$0xff] }
 0x2e2   : > { %v2620_v14 = vpop.eup %2619  ;;  %2115 = vst [vmem:[%s4167_s20 + $0x78] sm:$0xff] %v2051_v45  ;;  %2639 = vpow2.f32 %v2341_v1  ;;  %v1475_v41 = vmul.f32 %v4019_v17, %v1398_v28  ;;  %v1399_v16 = vmul.f32 %v2608_v6, %v4887_v52  ;;  %v1293_v60 = vmul.f32 0.00390625, %v1237_v24  ;;  %v1240_v6 = vpop.xlane.xlu0 %1239  ;;  %v4893_v1 = vld [vmem:[#allocation61_spill] sm:$0xff] }
 0x2e3   : > { %v2622_v36 = vpop.eup %2621  ;;  %v2052_v35 = vmul.f32 %v2620_v14, %v4195_v23  ;;  %2641 = vrcp.f32 %v1865_v4  ;;  %v2342_v54 = vmul.f32 -1.442695, %v4285_v30  ;;  %v4294_v50 = vadd.f32 %v1551_v10, %v4888_v3  ;;  %v1243_v10 = vpop.xlane.xlu1 %1242 }
 0x2e4   : > { %v2624_v55 = vpop.eup %2623  ;;  %v2053_v53 = vmul.f32 %v2622_v36, %v4198_v49  ;;  %2643 = vrsqrt.f32 %v1324_v44  ;;  %v1552_v43 = vadd.f32 %v4030_v58, %v1475_v41  ;;  %v1476_v29 = vmul.f32 %v4022_v22, %v1399_v16 }
 0x2e5   : > { %v2626_v7 = vpop.eup %2625  ;;  %2116 = vst [vmem:[%s4167_s20 + $0x80] sm:$0xff] %v2052_v35  ;;  %v1866_v46 = vadd.f32 1.0, %v2624_v55  ;;  %2645 = vpow2.f32 %v2342_v54  ;;  %v2343_v23 = vmul.f32 -1.442695, %v4294_v50  ;;  %v1325_v40 = vadd.f32 1e-05, %v1293_v60 }
 0x2e6   : > { %v2628_v19 = vpop.eup %2627  ;;  %2117 = vst [vmem:[%s4167_s20 + $0x88] sm:$0xff] %v2053_v53  ;;  %v4303_v25 = vadd.f32 %v1552_v43, %v4889_v39  ;;  %v1553_v49 = vadd.f32 %v4034_v34, %v1476_v29  ;;  %v1400_v27 = vmul.f32 %v2618_v57, %v4890_v21  ;;  %v1401_v56 = vmul.f32 %v2618_v57, %v4891_v2  ;;  %v4894_v55 = vld [vmem:[#allocation41_spill] sm:$0xff]  ;;  %v1246_v21 = vpop.xlane.xlu0 %1245 }
 0x2e7   : > { %v2630_v28 = vpop.eup %2629  ;;  %v2054_v63 = vmul.f32 %v2628_v19, %v4213_v31  ;;  %2647 = vrcp.f32 %v1866_v46  ;;  %v1294_v18 = vmul.f32 0.00390625, %v1240_v6  ;;  %v1402_v5 = vmul.f32 %v2626_v7, %v4892_v47  ;;  %v4895_v46 = vld [vmem:[#allocation62_spill] sm:$0xff] }
 0x2e8   : > { %v2632_v24 = vpop.eup %2631  ;;  %v1867_v37 = vadd.f32 1.0, %v2630_v28  ;;  %2649 = vpow2.f32 %v2343_v23  ;;  %v2344_v45 = vmul.f32 -1.442695, %v4303_v25  ;;  %v4312_v44 = vadd.f32 %v1553_v49, %v4893_v1 }
 0x2e9   : > { %v2634_v4 = vpop.eup %2633  ;;  %2118 = vst [vmem:[%s4167_s20 + $0x90] sm:$0xff] %v2054_v63  ;;  %v2055_v57 = vmul.f32 %v2632_v24, %v4221_v38  ;;  %2651 = vrsqrt.f32 %v1325_v40  ;;  %v1477_v31 = vmul.f32 %v4019_v17, %v1400_v27  ;;  %v1478_v13 = vmul.f32 %v4022_v22, %v1401_v56  ;;  %v4896_v40 = vld [vmem:[#allocation64_spill] sm:$0xff] }
 0x2ea   : > { %v2636_v14 = vpop.eup %2635  ;;  %2653 = vrcp.f32 %v1867_v37  ;;  %v1868_v41 = vadd.f32 1.0, %v2634_v4  ;;  %v2345_v52 = vmul.f32 -1.442695, %v4312_v44  ;;  %v1326_v16 = vadd.f32 1e-05, %v1294_v18  ;;  %v4897_v18 = vld [vmem:[#allocation67_spill] sm:$0xff] }
 0x2eb   : > { %v2638_v60 = vpop.eup %2637  ;;  %2119 = vst [vmem:[%s4167_s20 + $0x98] sm:$0xff] %v2055_v57  ;;  %2655 = vpow2.f32 %v2344_v45  ;;  %v1554_v36 = vadd.f32 %v4030_v58, %v1477_v31  ;;  %v1555_v38 = vadd.f32 %v4034_v34, %v1478_v13  ;;  %v1479_v35 = vmul.f32 %v4019_v17, %v1402_v5  ;;  %v4898_v5 = vld [vmem:[#allocation42_spill] sm:$0xff]  ;;  %v4899_v45 = vld [vmem:[#allocation43_spill] sm:$0xff]  ;;  %v4900_v57 = vld [vmem:[#allocation44_spill] sm:$0xff] }
 0x2ec   : > { %v2640_v54 = vpop.eup %2639  ;;  %v2056_v3 = vmul.f32 %v2638_v60, %v4231_v9  ;;  %2657 = vrcp.f32 %v1868_v41  ;;  %v1403_v53 = vmul.f32 %v2626_v7, %v4894_v55  ;;  %v1295_v43 = vmul.f32 0.00390625, %v1243_v10 }
 0x2ed   : > { %v2642_v29 = vpop.eup %2641  ;;  %v1869_v6 = vadd.f32 1.0, %v2640_v54  ;;  %2659 = vpow2.f32 %v2345_v52  ;;  %v4326_v23 = vadd.f32 %v1554_v36, %v4895_v46  ;;  %v4329_v19 = vadd.f32 %v1555_v38, %v4896_v40  ;;  %v4901_v52 = vld [vmem:[#allocation68_spill] sm:$0xff] }
 0x2ee   : > { %v2644_v39 = vpop.eup %2643  ;;  %2120 = vst [vmem:[%s4167_s20 + $0xa0] sm:$0xff] %v2056_v3  ;;  %v2057_v49 = vmul.f32 %v2642_v29, %v4239_v51  ;;  %2661 = vrsqrt.f32 %v1326_v16  ;;  %v1556_v9 = vadd.f32 %v4030_v58, %v1479_v35  ;;  %v1480_v7 = vmul.f32 %v4022_v22, %v1403_v53 }
 0x2ef   : > { %v2646_v27 = vpop.eup %2645  ;;  %2663 = vrcp.f32 %v1869_v6  ;;  %v2346_v2 = vmul.f32 -1.442695, %v4326_v23  ;;  %v2347_v56 = vmul.f32 -1.442695, %v4329_v19  ;;  %v1327_v28 = vadd.f32 1e-05, %v1295_v43 }
 0x2f0   : > { %2121 = vst [vmem:[%s4167_s20 + $0xa8] sm:$0xff] %v2057_v49  ;;  %v1870_v63 = vadd.f32 1.0, %v2646_v27  ;;  %v4339_v47 = vadd.f32 %v1556_v9, %v4897_v18  ;;  %v1557_v51 = vadd.f32 %v4034_v34, %v1480_v7  ;;  %v1404_v24 = vmul.f32 %v2636_v14, %v4898_v5  ;;  %v4902_v49 = vld [vmem:[#allocation45_spill] sm:$0xff]  ;;  %v1249_v7 = vpop.xlane.xlu1 %1248  ;;  %v4905_v5 = vld [vmem:[#allocation72_spill] sm:$0xff] }
 0x2f1   : > { %v2648_v37 = vpop.eup %2647  ;;  %2665 = vpow2.f32 %v2346_v2  ;;  %v1405_v1 = vmul.f32 %v2636_v14, %v4899_v45  ;;  %v1296_v4 = vmul.f32 0.00390625, %v1246_v21  ;;  %v1406_v31 = vmul.f32 %v2644_v39, %v4900_v57 }
 0x2f2   : > { %v2650_v13 = vpop.eup %2649  ;;  %v2058_v10 = vmul.f32 %v2648_v37, %v4248_v32  ;;  %2667 = vrcp.f32 %v1870_v63  ;;  %v2348_v41 = vmul.f32 -1.442695, %v4339_v47  ;;  %v4348_v16 = vadd.f32 %v1557_v51, %v4901_v52 }
 0x2f3   : > { %v2652_v60 = vpop.eup %2651  ;;  %v1871_v36 = vadd.f32 1.0, %v2650_v13  ;;  %2669 = vpow2.f32 %v2347_v56  ;;  %v1481_v38 = vmul.f32 %v4019_v17, %v1404_v24  ;;  %v1482_v35 = vmul.f32 %v4022_v22, %v1405_v1  ;;  %v4904_v56 = vld [vmem:[#allocation71_spill] sm:$0xff]  ;;  %v1252_v1 = vpop.xlane.xlu0 %1251 }
 0x2f4   : > { %v2654_v14 = vpop.eup %2653  ;;  %2122 = vst [vmem:[%s4167_s20 + $0xb0] sm:$0xff] %v2058_v10  ;;  %2671 = vpow2.f32 %v2348_v41  ;;  %v2349_v54 = vmul.f32 -1.442695, %v4348_v16  ;;  %v1328_v32 = vadd.f32 1e-05, %v1296_v4  ;;  %v1483_v3 = vmul.f32 %v4019_v17, %v1406_v31  ;;  %v4906_v41 = vld [vmem:[#allocation46_spill] sm:$0xff] }
 0x2f5   : > { %v2656_v55 = vpop.eup %2655  ;;  %v2059_v53 = vmul.f32 %v2654_v14, %v4259_v59  ;;  %2673 = vrcp.f32 %v1871_v36  ;;  %v1558_v43 = vadd.f32 %v4030_v58, %v1481_v38  ;;  %v1559_v29 = vadd.f32 %v4034_v34, %v1482_v35  ;;  %v4903_v59 = vld [vmem:[#allocation70_spill] sm:$0xff]  ;;  %v4907_v36 = vld [vmem:[#allocation47_spill] sm:$0xff] }
 0x2f6   : > { %v2658_v6 = vpop.eup %2657  ;;  %v1872_v46 = vadd.f32 1.0, %v2656_v55  ;;  %2675 = vpow2.f32 %v2349_v54  ;;  %v1560_v40 = vadd.f32 %v4030_v58, %v1483_v3  ;;  %v1407_v9 = vmul.f32 %v2644_v39, %v4902_v49  ;;  %v4908_v54 = vld [vmem:[#allocation73_spill] sm:$0xff] }
 0x2f7   : > { %v2660_v21 = vpop.eup %2659  ;;  %2123 = vst [vmem:[%s4167_s20 + $0xb8] sm:$0xff] %v2059_v53  ;;  %v2060_v27 = vmul.f32 %v2658_v6, %v4264_v42  ;;  %2677 = vrsqrt.f32 %v1327_v28  ;;  %v4363_v2 = vadd.f32 %v1558_v43, %v4903_v59  ;;  %v4366_v63 = vadd.f32 %v1559_v29, %v4904_v56  ;;  %v4909_v59 = vld [vmem:[#allocation48_spill] sm:$0xff] }
 0x2f8   : > { %v2662_v18 = vpop.eup %2661  ;;  %2679 = vrcp.f32 %v1872_v46  ;;  %v1873_v51 = vadd.f32 1.0, %v2660_v21  ;;  %v4369_v24 = vadd.f32 %v1560_v40, %v4905_v5  ;;  %v1484_v39 = vmul.f32 %v4022_v22, %v1407_v9 }
 0x2f9   : > { %v2664_v37 = vpop.eup %2663  ;;  %2124 = vst [vmem:[%s4167_s20 + $0xc0] sm:$0xff] %v2060_v27  ;;  %v2350_v42 = vmul.f32 -1.442695, %v4363_v2  ;;  %v2351_v28 = vmul.f32 -1.442695, %v4366_v63  ;;  %2681 = vrsqrt.f32 %v1328_v32  ;;  %v1297_v45 = vmul.f32 0.00390625, %v1249_v7  ;;  %v1255_v7 = vpop.xlane.xlu1 %1254 }
 0x2fa   : > { %v2061_v4 = vmul.f32 %v2664_v37, %v4276_v20  ;;  %2683 = vrcp.f32 %v1873_v51  ;;  %v2352_v57 = vmul.f32 -1.442695, %v4369_v24  ;;  %v1561_v31 = vadd.f32 %v4034_v34, %v1484_v39  ;;  %v4910_v51 = vld [vmem:[#allocation49_spill] sm:$0xff] }
 0x2fb   : > { %v2666_v13 = vpop.eup %2665  ;;  %2685 = vpow2.f32 %v2350_v42  ;;  %v1329_v10 = vadd.f32 1e-05, %v1297_v45  ;;  %v1408_v52 = vmul.f32 %v2652_v60, %v4906_v41  ;;  %v1409_v38 = vmul.f32 %v2652_v60, %v4907_v36  ;;  %v4911_v42 = vld [vmem:[#allocation74_spill] sm:$0xff]  ;;  %v4912_v45 = vld [vmem:[#allocation75_spill] sm:$0xff] }
 0x2fc   : > { %v2668_v35 = vpop.eup %2667  ;;  %2125 = vst [vmem:[%s4167_s20 + $0xc8] sm:$0xff] %v2061_v4  ;;  %v1874_v14 = vadd.f32 1.0, %v2666_v13  ;;  %2687 = vpow2.f32 %v2351_v28  ;;  %v4382_v32 = vadd.f32 %v1561_v31, %v4908_v54  ;;  %v1298_v20 = vmul.f32 0.00390625, %v1252_v1 }
 0x2fd   : > { %v2670_v3 = vpop.eup %2669  ;;  %v2062_v55 = vmul.f32 %v2668_v35, %v4285_v30  ;;  %2689 = vpow2.f32 %v2352_v57  ;;  %v1485_v53 = vmul.f32 %v4019_v17, %v1408_v52  ;;  %v1486_v43 = vmul.f32 %v4022_v22, %v1409_v38 }
 0x2fe   : > { %v2672_v29 = vpop.eup %2671  ;;  %2691 = vrcp.f32 %v1874_v14  ;;  %v1875_v60 = vadd.f32 1.0, %v2670_v3  ;;  %v2353_v6 = vmul.f32 -1.442695, %v4382_v32  ;;  %v1330_v46 = vadd.f32 1e-05, %v1298_v20  ;;  %v4913_v20 = vld [vmem:[#allocation50_spill] sm:$0xff] }
 0x2ff   : > { %v2674_v40 = vpop.eup %2673  ;;  %2126 = vst [vmem:[%s4167_s20 + $0xd0] sm:$0xff] %v2062_v55  ;;  %v1876_v49 = vadd.f32 1.0, %v2672_v29  ;;  %2693 = vrsqrt.f32 %v1329_v10  ;;  %v1562_v9 = vadd.f32 %v4030_v58, %v1485_v53  ;;  %v1563_v30 = vadd.f32 %v4034_v34, %v1486_v43  ;;  %v4914_v3 = vld [vmem:[#allocation51_spill] sm:$0xff]  ;;  %v4915_v29 = vld [vmem:[#allocation76_spill] sm:$0xff] }
 0x300   : > { %v2676_v21 = vpop.eup %2675  ;;  %v2063_v27 = vmul.f32 %v2674_v40, %v4294_v50  ;;  %2695 = vrcp.f32 %v1875_v60  ;;  %v1410_v56 = vmul.f32 %v2662_v18, %v4909_v59  ;;  %v1411_v5 = vmul.f32 %v2662_v18, %v4910_v51 }
 0x301   : > { %v2678_v39 = vpop.eup %2677  ;;  %2697 = vrcp.f32 %v1876_v49  ;;  %v1877_v37 = vadd.f32 1.0, %v2676_v21  ;;  %v4395_v28 = vadd.f32 %v1562_v9, %v4911_v42  ;;  %v4398_v1 = vadd.f32 %v1563_v30, %v4912_v45  ;;  %v1258_v30 = vpop.xlane.xlu0 %1257  ;;  %v4917_v45 = vld [vmem:[#allocation52_spill] sm:$0xff] }
 0x302   : > { %v2680_v4 = vpop.eup %2679  ;;  %2127 = vst [vmem:[%s4167_s20 + $0xd8] sm:$0xff] %v2063_v27  ;;  %2699 = vpow2.f32 %v2353_v6  ;;  %v1487_v50 = vmul.f32 %v4019_v17, %v1410_v56  ;;  %v1488_v57 = vmul.f32 %v4022_v22, %v1411_v5  ;;  %v1299_v31 = vmul.f32 0.00390625, %v1255_v7  ;;  %v4916_v6 = vld [vmem:[#allocation77_spill] sm:$0xff] }
 0x303   : > { %v2682_v13 = vpop.eup %2681  ;;  %v2064_v18 = vmul.f32 %v2680_v4, %v4303_v25  ;;  %2701 = vrcp.f32 %v1877_v37  ;;  %v2354_v10 = vmul.f32 -1.442695, %v4395_v28  ;;  %v2355_v41 = vmul.f32 -1.442695, %v4398_v1 }
 0x304   : > { %v2684_v52 = vpop.eup %2683  ;;  %2703 = vrsqrt.f32 %v1330_v46  ;;  %v1564_v36 = vadd.f32 %v4030_v58, %v1487_v50  ;;  %v1565_v38 = vadd.f32 %v4034_v34, %v1488_v57  ;;  %v1331_v35 = vadd.f32 1e-05, %v1299_v31  ;;  %v4918_v50 = vld [vmem:[#allocation53_spill] sm:$0xff] }
 0x305   : > { %v2686_v14 = vpop.eup %2685  ;;  %2128 = vst [vmem:[%s4167_s20 + $0xe0] sm:$0xff] %v2064_v18  ;;  %v2065_v54 = vmul.f32 %v2684_v52, %v4312_v44  ;;  %2705 = vpow2.f32 %v2354_v10  ;;  %v1412_v25 = vmul.f32 %v2678_v39, %v4913_v20  ;;  %v1413_v55 = vmul.f32 %v2678_v39, %v4914_v3  ;;  %v4919_v10 = vld [vmem:[#allocation78_spill] sm:$0xff] }
 0x306   : > { %v2688_v53 = vpop.eup %2687  ;;  %v1878_v43 = vadd.f32 1.0, %v2686_v14  ;;  %2707 = vpow2.f32 %v2355_v41  ;;  %v4413_v60 = vadd.f32 %v1564_v36, %v4915_v29  ;;  %v4416_v46 = vadd.f32 %v1565_v38, %v4916_v6  ;;  %v4920_v41 = vld [vmem:[#allocation79_spill] sm:$0xff]  ;;  %v1261_v36 = vpop.xlane.xlu1 %1260 }
 0x307   : > { %v2690_v40 = vpop.eup %2689  ;;  %2129 = vst [vmem:[%s4167_s20 + $0xe8] sm:$0xff] %v2065_v54  ;;  %v1879_v49 = vadd.f32 1.0, %v2688_v53  ;;  %2709 = vrsqrt.f32 %v1331_v35  ;;  %v1489_v44 = vmul.f32 %v4019_v17, %v1412_v25  ;;  %v1490_v9 = vmul.f32 %v4022_v22, %v1413_v55 }
 0x308   : > { %v2692_v7 = vpop.eup %2691  ;;  %2711 = vrcp.f32 %v1878_v43  ;;  %v1880_v21 = vadd.f32 1.0, %v2690_v40  ;;  %v2356_v27 = vmul.f32 -1.442695, %v4413_v60  ;;  %v2357_v59 = vmul.f32 -1.442695, %v4416_v46  ;;  %v4921_v40 = vld [vmem:[#allocation54_spill] sm:$0xff] }
 0x309   : > { %v2694_v56 = vpop.eup %2693  ;;  %v2066_v51 = vmul.f32 %v2692_v7, %v4326_v23  ;;  %2713 = vrcp.f32 %v1879_v49  ;;  %v1566_v5 = vadd.f32 %v4030_v58, %v1489_v44  ;;  %v1567_v39 = vadd.f32 %v4034_v34, %v1490_v9  ;;  %v4922_v44 = vld [vmem:[#allocation55_spill] sm:$0xff] }
 0x30a   : > { %v2696_v37 = vpop.eup %2695  ;;  %2715 = vrcp.f32 %v1880_v21  ;;  %v1300_v42 = vmul.f32 0.00390625, %v1258_v30  ;;  %v1414_v4 = vmul.f32 %v2682_v13, %v4917_v45  ;;  %v1415_v57 = vmul.f32 %v2682_v13, %v4918_v50  ;;  %v1264_v30 = vpop.xlane.xlu0 %1263 }
 0x30b   : > { %v2698_v31 = vpop.eup %2697  ;;  %2130 = vst [vmem:[%s4167_s20 + $0xf0] sm:$0xff] %v2066_v51  ;;  %v2067_v18 = vmul.f32 %v2696_v37, %v4329_v19  ;;  %2717 = vpow2.f32 %v2356_v27  ;;  %v4431_v23 = vadd.f32 %v1566_v5, %v4919_v10  ;;  %v4434_v52 = vadd.f32 %v1567_v39, %v4920_v41  ;;  %v4923_v27 = vld [vmem:[#allocation80_spill] sm:$0xff]  ;;  %v4924_v39 = vld [vmem:[#allocation81_spill] sm:$0xff] }
 0x30c   : > { %v2700_v38 = vpop.eup %2699  ;;  %v2068_v35 = vmul.f32 %v2698_v31, %v4339_v47  ;;  %2719 = vpow2.f32 %v2357_v59  ;;  %v1332_v14 = vadd.f32 1e-05, %v1300_v42  ;;  %v1491_v13 = vmul.f32 %v4019_v17, %v1414_v4 }
 0x30d   : > { %v2702_v54 = vpop.eup %2701  ;;  %2131 = vst [vmem:[%s4167_s20 + $0xf8] sm:$0xff] %v2067_v18  ;;  %v1881_v20 = vadd.f32 1.0, %v2700_v38  ;;  %v2358_v19 = vmul.f32 -1.442695, %v4431_v23  ;;  %v2359_v25 = vmul.f32 -1.442695, %v4434_v52  ;;  %v1492_v3 = vmul.f32 %v4022_v22, %v1415_v57 }
 0x30e   : > { %v2704_v55 = vpop.eup %2703  ;;  %2132 = vst [vmem:[%s4167_s20 + $0x100] sm:$0xff] %v2068_v35  ;;  %v2069_v53 = vmul.f32 %v2702_v54, %v4348_v16  ;;  %2721 = vrsqrt.f32 %v1332_v14  ;;  %v1568_v47 = vadd.f32 %v4030_v58, %v1491_v13  ;;  %v1301_v43 = vmul.f32 0.00390625, %v1261_v36 }
 0x30f   : > { %v2706_v29 = vpop.eup %2705  ;;  %2723 = vrcp.f32 %v1881_v20  ;;  %v1569_v6 = vadd.f32 %v4034_v34, %v1492_v3  ;;  %v1416_v49 = vmul.f32 %v2694_v56, %v4921_v40  ;;  %v1417_v9 = vmul.f32 %v2694_v56, %v4922_v44  ;;  %v4926_v20 = vld [vmem:[#allocation56_spill] sm:$0xff] }
 0x310   : > { %v2708_v7 = vpop.eup %2707  ;;  %2133 = vst [vmem:[%s4167_s20 + $0x108] sm:$0xff] %v2069_v53  ;;  %v1882_v21 = vadd.f32 1.0, %v2706_v29  ;;  %2725 = vpow2.f32 %v2358_v19  ;;  %v4450_v59 = vadd.f32 %v1568_v47, %v4923_v27  ;;  %v1333_v16 = vadd.f32 1e-05, %v1301_v43  ;;  %v4928_v43 = vld [vmem:[#allocation14_spill] sm:$0xff] }
 0x311   : > { %v2710_v51 = vpop.eup %2709  ;;  %v1883_v5 = vadd.f32 1.0, %v2708_v7  ;;  %2727 = vpow2.f32 %v2359_v25  ;;  %v4453_v37 = vadd.f32 %v1569_v6, %v4924_v39  ;;  %v1493_v42 = vmul.f32 %v4019_v17, %v1416_v49  ;;  %v1267_v25 = vpop.xlane.xlu1 %1266 }
 0x312   : > { %v2712_v45 = vpop.eup %2711  ;;  %2729 = vrcp.f32 %v1882_v21  ;;  %v2360_v56 = vmul.f32 -1.442695, %v4450_v59  ;;  %v1494_v4 = vmul.f32 %v4022_v22, %v1417_v9  ;;  %v1302_v50 = vmul.f32 0.00390625, %v1264_v30 }
 0x313   : > { %v2714_v57 = vpop.eup %2713  ;;  %v2070_v31 = vmul.f32 %v2712_v45, %v4363_v2  ;;  %2731 = vrcp.f32 %v1883_v5  ;;  %v2361_v18 = vmul.f32 -1.442695, %v4453_v37  ;;  %v1570_v10 = vadd.f32 %v4030_v58, %v1493_v42  ;;  %v4925_v2 = vld [vmem:[#allocation82_spill] sm:$0xff] }
 0x314   : > { %v2716_v41 = vpop.eup %2715  ;;  %v2071_v36 = vmul.f32 %v2714_v57, %v4366_v63  ;;  %2733 = vpow2.f32 %v2360_v56  ;;  %v1571_v38 = vadd.f32 %v4034_v34, %v1494_v4  ;;  %v1334_v35 = vadd.f32 1e-05, %v1302_v50  ;;  %v4927_v63 = vld [vmem:[#allocation83_spill] sm:$0xff]  ;;  %v4931_v57 = vld [vmem:[#allocation84_spill] sm:$0xff] }
 0x315   : > { %v2718_v14 = vpop.eup %2717  ;;  %2134 = vst [vmem:[%s4167_s20 + $0x110] sm:$0xff] %v2070_v31  ;;  %v2072_v13 = vmul.f32 %v2716_v41, %v4369_v24  ;;  %2735 = vpow2.f32 %v2361_v18  ;;  %v4466_v54 = vadd.f32 %v1570_v10, %v4925_v2  ;;  %v1418_v19 = vmul.f32 %v2704_v55, %v4926_v20 }
 0x316   : > { %v2720_v3 = vpop.eup %2719  ;;  %2135 = vst [vmem:[%s4167_s20 + $0x118] sm:$0xff] %v2071_v36  ;;  %v1884_v53 = vadd.f32 1.0, %v2718_v14  ;;  %2737 = vrsqrt.f32 %v1333_v16  ;;  %v4471_v47 = vadd.f32 %v1571_v38, %v4927_v63  ;;  %v1419_v29 = vmul.f32 %v2704_v55, %v4928_v43  ;;  %v4929_v55 = vld [vmem:[#allocation15_spill] sm:$0xff]  ;;  %v4930_v16 = vld [vmem:[#allocation16_spill] sm:$0xff]  ;;  %v1270_v38 = vpop.xlane.xlu0 %1269  ;;  %v4933_v43 = vld [vmem:[#allocation13_spill] sm:$0xff] }
 0x317   : > { %2136 = vst [vmem:[%s4167_s20 + $0x120] sm:$0xff] %v2072_v13  ;;  %v1885_v6 = vadd.f32 1.0, %v2720_v3  ;;  %v2362_v24 = vmul.f32 -1.442695, %v4466_v54  ;;  %2739 = vrsqrt.f32 %v1334_v35  ;;  %v1495_v40 = vmul.f32 %v4019_v17, %v1418_v19  ;;  %v4932_v36 = vld [vmem:[#allocation12_spill] sm:$0xff] }
 0x318   : > { %v2722_v49 = vpop.eup %2721  ;;  %2741 = vrcp.f32 %v1884_v53  ;;  %v2363_v44 = vmul.f32 -1.442695, %v4471_v47  ;;  %v1496_v9 = vmul.f32 %v4022_v22, %v1419_v29  ;;  %v1303_v30 = vmul.f32 0.00390625, %v1267_v25 }
 0x319   : > { %v2724_v7 = vpop.eup %2723  ;;  %2743 = vrcp.f32 %v1885_v6  ;;  %v1572_v21 = vadd.f32 %v4030_v58, %v1495_v40  ;;  %v1420_v27 = vmul.f32 %v2710_v51, %v4929_v55  ;;  %v1421_v5 = vmul.f32 %v2710_v51, %v4930_v16  ;;  %v1273_v6 = vpop.xlane.xlu1 %1272  ;;  %v4935_v55 = vld [vmem:[#allocation18_spill] sm:$0xff] }
 0x31a   : > { %v2726_v39 = vpop.eup %2725  ;;  %v2073_v42 = vmul.f32 %v2724_v7, %v4382_v32  ;;  %2745 = vpow2.f32 %v2362_v24  ;;  %v1573_v45 = vadd.f32 %v4034_v34, %v1496_v9  ;;  %v1335_v56 = vadd.f32 1e-05, %v1303_v30 }
 0x31b   : > { %v2728_v4 = vpop.eup %2727  ;;  %v1886_v50 = vadd.f32 1.0, %v2726_v39  ;;  %2747 = vpow2.f32 %v2363_v44  ;;  %v4485_v31 = vadd.f32 %v1572_v21, %v4931_v57  ;;  %v1497_v18 = vmul.f32 %v4019_v17, %v1420_v27  ;;  %v4934_v44 = vld [vmem:[#allocation17_spill] sm:$0xff] }
 0x31c   : > { %v2730_v10 = vpop.eup %2729  ;;  %2137 = vst [vmem:[%s4167_s20 + $0x128] sm:$0xff] %v2073_v42  ;;  %v1887_v41 = vadd.f32 1.0, %v2728_v4  ;;  %v4490_v51 = vadd.f32 %v1573_v45, %v4932_v36  ;;  %2749 = vrsqrt.f32 %v1335_v56  ;;  %v1498_v32 = vmul.f32 %v4022_v22, %v1421_v5  ;;  %v4936_v4 = vld [vmem:[#allocation19_spill] sm:$0xff] }
 0x31d   : > { %v2732_v35 = vpop.eup %2731  ;;  %v2074_v14 = vmul.f32 %v2730_v10, %v4395_v28  ;;  %2751 = vrcp.f32 %v1886_v50  ;;  %v2364_v13 = vmul.f32 -1.442695, %v4485_v31  ;;  %v1574_v2 = vadd.f32 %v4030_v58, %v1497_v18 }
 0x31e   : > { %v2734_v20 = vpop.eup %2733  ;;  %v2075_v19 = vmul.f32 %v2732_v35, %v4398_v1  ;;  %2753 = vrcp.f32 %v1887_v41  ;;  %v2365_v25 = vmul.f32 -1.442695, %v4490_v51  ;;  %v1575_v3 = vadd.f32 %v4034_v34, %v1498_v32 }
 0x31f   : > { %v2736_v53 = vpop.eup %2735  ;;  %2138 = vst [vmem:[%s4167_s20 + $0x130] sm:$0xff] %v2074_v14  ;;  %v1888_v63 = vadd.f32 1.0, %v2734_v20  ;;  %2755 = vpow2.f32 %v2364_v13  ;;  %v4501_v28 = vadd.f32 %v1574_v2, %v4933_v43  ;;  %v1304_v29 = vmul.f32 0.00390625, %v1270_v38 }
 0x320   : > { %v2738_v24 = vpop.eup %2737  ;;  %2139 = vst [vmem:[%s4167_s20 + $0x138] sm:$0xff] %v2075_v19  ;;  %v1889_v40 = vadd.f32 1.0, %v2736_v53  ;;  %2757 = vpow2.f32 %v2365_v25  ;;  %v4505_v1 = vadd.f32 %v1575_v3, %v4036_v11  ;;  %v1422_v9 = vmul.f32 %v2722_v49, %v4934_v44  ;;  %v4938_v25 = vld [vmem:[#allocation63_spill] sm:$0xff] }
 0x321   : > { %v2740_v30 = vpop.eup %2739  ;;  %2759 = vrcp.f32 %v1888_v63  ;;  %v2366_v7 = vmul.f32 -1.442695, %v4501_v28  ;;  %v1336_v21 = vadd.f32 1e-05, %v1304_v29  ;;  %v1423_v27 = vmul.f32 %v2722_v49, %v4935_v55 }
 0x322   : > { %v2742_v16 = vpop.eup %2741  ;;  %2761 = vrcp.f32 %v1889_v40  ;;  %v2367_v5 = vmul.f32 -1.442695, %v4505_v1  ;;  %v1499_v39 = vmul.f32 %v4019_v17, %v1422_v9  ;;  %v1305_v42 = vmul.f32 0.00390625, %v1273_v6 }
 0x323   : > { %v2744_v45 = vpop.eup %2743  ;;  %v2076_v11 = vmul.f32 %v2742_v16, %v4413_v60  ;;  %2763 = vpow2.f32 %v2366_v7  ;;  %v1500_v56 = vmul.f32 %v4022_v22, %v1423_v27  ;;  %v1424_v50 = vmul.f32 %v2738_v24, %v4936_v4  ;;  %v4939_v7 = vld [vmem:[#allocation21_spill] sm:$0xff] }
 0x324   : > { %v2746_v57 = vpop.eup %2745  ;;  %v2077_v49 = vmul.f32 %v2744_v45, %v4416_v46  ;;  %2765 = vpow2.f32 %v2367_v5  ;;  %v1576_v18 = vadd.f32 %v4030_v58, %v1499_v39  ;;  %v1337_v10 = vadd.f32 1e-05, %v1305_v42  ;;  %v4937_v46 = vld [vmem:[#allocation20_spill] sm:$0xff] }
 0x325   : > { %v2748_v41 = vpop.eup %2747  ;;  %2140 = vst [vmem:[%s4167_s20 + $0x140] sm:$0xff] %v2076_v11  ;;  %v1890_v36 = vadd.f32 1.0, %v2746_v57  ;;  %2767 = vrsqrt.f32 %v1336_v21  ;;  %v1577_v32 = vadd.f32 %v4034_v34, %v1500_v56  ;;  %v1501_v60 = vmul.f32 %v4019_v17, %v1424_v50  ;;  %v4940_v56 = vld [vmem:[#allocation22_spill] sm:$0xff] }
 0x326   : > { %v2750_v38 = vpop.eup %2749  ;;  %2141 = vst [vmem:[%s4167_s20 + $0x148] sm:$0xff] %v2077_v49  ;;  %v1891_v35 = vadd.f32 1.0, %v2748_v41  ;;  %v4522_v14 = vadd.f32 %v1576_v18, %v4052_v8  ;;  %2769 = vrsqrt.f32 %v1337_v10  ;;  %v1425_v13 = vmul.f32 %v2738_v24, %v4937_v46  ;;  %v4941_v41 = vld [vmem:[#allocation23_spill] sm:$0xff]  ;;  %v4943_v46 = vld [vmem:[#allocation66_spill] sm:$0xff] }
 0x327   : > { %v2752_v2 = vpop.eup %2751  ;;  %2771 = vrcp.f32 %v1890_v36  ;;  %v4526_v20 = vadd.f32 %v1577_v32, %v4054_v62  ;;  %v1578_v19 = vadd.f32 %v4030_v58, %v1501_v60  ;;  %v1426_v3 = vmul.f32 %v2740_v30, %v4938_v25  ;;  %v4942_v60 = vld [vmem:[#allocation65_spill] sm:$0xff] }
 0x328   : > { %v2754_v53 = vpop.eup %2753  ;;  %v2078_v63 = vmul.f32 %v2752_v2, %v4431_v23  ;;  %2773 = vrcp.f32 %v1891_v35  ;;  %v2368_v8 = vmul.f32 -1.442695, %v4522_v14  ;;  %v1502_v43 = vmul.f32 %v4022_v22, %v1425_v13 }
 0x329   : > { %v2756_v29 = vpop.eup %2755  ;;  %v2079_v6 = vmul.f32 %v2754_v53, %v4434_v52  ;;  %v2369_v24 = vmul.f32 -1.442695, %v4526_v20  ;;  %v4536_v62 = vadd.f32 %v1578_v19, %v4062_v15  ;;  %v1503_v40 = vmul.f32 %v4019_v17, %v1426_v3  ;;  %v4944_v3 = vld [vmem:[#allocation69_spill] sm:$0xff] }
 0x32a   : > { %v2758_v44 = vpop.eup %2757  ;;  %2142 = vst [vmem:[%s4167_s20 + $0x150] sm:$0xff] %v2078_v63  ;;  %v1892_v9 = vadd.f32 1.0, %v2756_v29  ;;  %2775 = vpow2.f32 %v2368_v8  ;;  %v1579_v23 = vadd.f32 %v4034_v34, %v1502_v43  ;;  %v1427_v21 = vmul.f32 %v2740_v30, %v4939_v7  ;;  %v4945_v7 = vld [vmem:[#allocation25_spill] sm:$0xff] }
 0x32b   : > { %v2760_v55 = vpop.eup %2759  ;;  %2143 = vst [vmem:[%s4167_s20 + $0x158] sm:$0xff] %v2079_v6  ;;  %v1893_v27 = vadd.f32 1.0, %v2758_v44  ;;  %2777 = vpow2.f32 %v2369_v24  ;;  %v2370_v52 = vmul.f32 -1.442695, %v4536_v62  ;;  %v1580_v15 = vadd.f32 %v4030_v58, %v1503_v40 }
 0x32c   : > { %v2762_v16 = vpop.eup %2761  ;;  %v2080_v5 = vmul.f32 %v2760_v55, %v4450_v59  ;;  %2779 = vrcp.f32 %v1892_v9  ;;  %v4547_v39 = vadd.f32 %v1579_v23, %v4072_v48  ;;  %v1504_v42 = vmul.f32 %v4022_v22, %v1427_v21 }
 0x32d   : > { %v2764_v30 = vpop.eup %2763  ;;  %v2081_v45 = vmul.f32 %v2762_v16, %v4453_v37  ;;  %2781 = vrcp.f32 %v1893_v27  ;;  %v4552_v11 = vadd.f32 %v1580_v15, %v4106_v0  ;;  %v1428_v4 = vmul.f32 %v2750_v38, %v4940_v56 }
 0x32e   : > { %v2766_v50 = vpop.eup %2765  ;;  %2144 = vst [vmem:[%s4167_s20 + $0x160] sm:$0xff] %v2080_v5  ;;  %v1894_v57 = vadd.f32 1.0, %v2764_v30  ;;  %2783 = vpow2.f32 %v2370_v52  ;;  %v2371_v59 = vmul.f32 -1.442695, %v4547_v39  ;;  %v1581_v48 = vadd.f32 %v4034_v34, %v1504_v42 }
 0x32f   : > { %v2768_v49 = vpop.eup %2767  ;;  %2145 = vst [vmem:[%s4167_s20 + $0x168] sm:$0xff] %v2081_v45  ;;  %v1895_v18 = vadd.f32 1.0, %v2766_v50  ;;  %v2372_v10 = vmul.f32 -1.442695, %v4552_v11  ;;  %v1505_v37 = vmul.f32 %v4019_v17, %v1428_v4  ;;  %v1429_v0 = vmul.f32 %v2750_v38, %v4941_v41 }
 0x330   : > { %v2770_v36 = vpop.eup %2769  ;;  %2785 = vrcp.f32 %v1894_v57  ;;  %v4563_v32 = vadd.f32 %v1581_v48, %v4109_v61  ;;  %v1430_v35 = vmul.f32 %v2768_v49, %v4942_v60  ;;  %v1431_v13 = vmul.f32 %v2768_v49, %v4943_v46  ;;  %v4947_v57 = vld [vmem:[#allocation26_spill] sm:$0xff] }
 0x331   : > { %v2772_v2 = vpop.eup %2771  ;;  %2787 = vrcp.f32 %v1895_v18  ;;  %v1582_v19 = vadd.f32 %v4030_v58, %v1505_v37  ;;  %v1506_v25 = vmul.f32 %v4022_v22, %v1429_v0  ;;  %v1432_v53 = vmul.f32 %v2770_v36, %v4944_v3  ;;  %v4948_v18 = vld [vmem:[#allocation85_spill] sm:$0xff] }
 0x332   : > { %v2774_v63 = vpop.eup %2773  ;;  %v2082_v38 = vmul.f32 %v2772_v2, %v4466_v54  ;;  %2789 = vpow2.f32 %v2371_v59  ;;  %v2373_v61 = vmul.f32 -1.442695, %v4563_v32  ;;  %v1507_v8 = vmul.f32 %v4019_v17, %v1430_v35 }
 0x333   : > { %v2083_v43 = vmul.f32 %v2774_v63, %v4471_v47  ;;  %2791 = vpow2.f32 %v2372_v10  ;;  %v4575_v29 = vadd.f32 %v1582_v19, %v4117_v26  ;;  %v1583_v6 = vadd.f32 %v4034_v34, %v1506_v25  ;;  %v4946_v26 = vld [vmem:[#allocation24_spill] sm:$0xff] }
 0x334   : > { %v2776_v24 = vpop.eup %2775  ;;  %2146 = vst [vmem:[%s4167_s20 + $0x170] sm:$0xff] %v2082_v38  ;;  %2793 = vpow2.f32 %v2373_v61  ;;  %v1584_v40 = vadd.f32 %v4030_v58, %v1507_v8  ;;  %v1508_v54 = vmul.f32 %v4022_v22, %v1431_v13  ;;  %v1509_v44 = vmul.f32 %v4019_v17, %v1432_v53 }
 0x335   : > { %v2778_v9 = vpop.eup %2777  ;;  %2147 = vst [vmem:[%s4167_s20 + $0x178] sm:$0xff] %v2083_v43  ;;  %v1896_v23 = vadd.f32 1.0, %v2776_v24  ;;  %v2374_v47 = vmul.f32 -1.442695, %v4575_v29  ;;  %v4585_v21 = vadd.f32 %v1583_v6, %v4945_v7  ;;  %v1433_v55 = vmul.f32 %v2770_v36, %v4946_v26 }
 0x336   : > { %v2780_v27 = vpop.eup %2779  ;;  %v1897_v52 = vadd.f32 1.0, %v2778_v9  ;;  %v4589_v15 = vadd.f32 %v1584_v40, %v4135_v33  ;;  %v1585_v16 = vadd.f32 %v4034_v34, %v1508_v54  ;;  %v1586_v17 = vadd.f32 %v4030_v58, %v1509_v44 }
 0x337   : > { %v2782_v5 = vpop.eup %2781  ;;  %v2084_v42 = vmul.f32 %v2780_v27, %v4485_v31  ;;  %2795 = vrcp.f32 %v1896_v23  ;;  %v2375_v30 = vmul.f32 -1.442695, %v4585_v21  ;;  %v1510_v45 = vmul.f32 %v4022_v22, %v1433_v55 }
 0x338   : > { %v2784_v56 = vpop.eup %2783  ;;  %v2085_v4 = vmul.f32 %v2782_v5, %v4490_v51  ;;  %2797 = vrcp.f32 %v1897_v52  ;;  %v2376_v33 = vmul.f32 -1.442695, %v4589_v15  ;;  %v4599_v50 = vadd.f32 %v1585_v16, %v4142_v12 }
 0x339   : > { %2148 = vst [vmem:[%s4167_s20 + $0x180] sm:$0xff] %v2084_v42  ;;  %v1898_v58 = vadd.f32 1.0, %v2784_v56  ;;  %2799 = vpow2.f32 %v2374_v47  ;;  %v4603_v31 = vadd.f32 %v1586_v17, %v4947_v57  ;;  %v1587_v59 = vadd.f32 %v4034_v34, %v1510_v45 }
 0x33a   : > { %v2786_v48 = vpop.eup %2785  ;;  %2149 = vst [vmem:[%s4167_s20 + $0x188] sm:$0xff] %v2085_v4  ;;  %2801 = vpow2.f32 %v2375_v30  ;;  %v2377_v22 = vmul.f32 -1.442695, %v4599_v50 }
 0x33b   : > { %v2788_v51 = vpop.eup %2787  ;;  %v2086_v49 = vmul.f32 %v2786_v48, %v4501_v28  ;;  %2803 = vrcp.f32 %v1898_v58  ;;  %v2378_v12 = vmul.f32 -1.442695, %v4603_v31  ;;  %v4611_v10 = vadd.f32 %v1587_v59, %v4948_v18 }
 0x33c   : > { %v2790_v37 = vpop.eup %2789  ;;  %v2087_v41 = vmul.f32 %v2788_v51, %v4505_v1  ;;  %2805 = vpow2.f32 %v2376_v33 }
 0x33d   : > { %v2792_v34 = vpop.eup %2791  ;;  %2150 = vst [vmem:[%s4167_s20 + $0x190] sm:$0xff] %v2086_v49  ;;  %v1899_v0 = vadd.f32 1.0, %v2790_v37  ;;  %2807 = vpow2.f32 %v2377_v22  ;;  %v2379_v28 = vmul.f32 -1.442695, %v4611_v10 }
 0x33e   : > { %v2794_v36 = vpop.eup %2793  ;;  %2151 = vst [vmem:[%s4167_s20 + $0x198] sm:$0xff] %v2087_v41  ;;  %v1900_v60 = vadd.f32 1.0, %v2792_v34  ;;  %2809 = vpow2.f32 %v2378_v12 }
 0x33f   : > { %2811 = vrcp.f32 %v1899_v0  ;;  %v1901_v35 = vadd.f32 1.0, %v2794_v36 }
 0x340   : > { %2813 = vrcp.f32 %v1900_v60 }
 0x341   : > { %v2796_v46 = vpop.eup %2795  ;;  %2815 = vrcp.f32 %v1901_v35 }
 0x342   : > { %v2798_v13 = vpop.eup %2797  ;;  %v2088_v1 = vmul.f32 %v2796_v46, %v4522_v14  ;;  %2817 = vpow2.f32 %v2379_v28 }
 0x343   : > { %v2800_v2 = vpop.eup %2799  ;;  %v2089_v19 = vmul.f32 %v2798_v13, %v4526_v20 }
 0x344   : > { %v2802_v25 = vpop.eup %2801  ;;  %2152 = vst [vmem:[%s4167_s20 + $0x1a0] sm:$0xff] %v2088_v1  ;;  %v1902_v3 = vadd.f32 1.0, %v2800_v2 }
 0x345   : > { %v2804_v53 = vpop.eup %2803  ;;  %2153 = vst [vmem:[%s4167_s20 + $0x1a8] sm:$0xff] %v2089_v19  ;;  %v1903_v63 = vadd.f32 1.0, %v2802_v25 }
 0x346   : > { %v2806_v38 = vpop.eup %2805  ;;  %v2090_v61 = vmul.f32 %v2804_v53, %v4536_v62  ;;  %2819 = vrcp.f32 %v1902_v3 }
 0x347   : > { %v2808_v8 = vpop.eup %2807  ;;  %2821 = vrcp.f32 %v1903_v63  ;;  %v1904_v43 = vadd.f32 1.0, %v2806_v38 }
 0x348   : > { %v2810_v14 = vpop.eup %2809  ;;  %2154 = vst [vmem:[%s4167_s20 + $0x1b0] sm:$0xff] %v2090_v61  ;;  %v1905_v6 = vadd.f32 1.0, %v2808_v8 }
 0x349   : > { %v2812_v20 = vpop.eup %2811  ;;  %2823 = vrcp.f32 %v1904_v43  ;;  %v1906_v24 = vadd.f32 1.0, %v2810_v14 }
 0x34a   : > { %v2814_v40 = vpop.eup %2813  ;;  %v2091_v54 = vmul.f32 %v2812_v20, %v4547_v39  ;;  %2825 = vrcp.f32 %v1905_v6 }
 0x34b   : > { %v2816_v44 = vpop.eup %2815  ;;  %v2092_v62 = vmul.f32 %v2814_v40, %v4552_v11  ;;  %2827 = vrcp.f32 %v1906_v24 }
 0x34c   : > { %v2818_v9 = vpop.eup %2817  ;;  %2155 = vst [vmem:[%s4167_s20 + $0x1b8] sm:$0xff] %v2091_v54  ;;  %v2093_v23 = vmul.f32 %v2816_v44, %v4563_v32 }
 0x34d   : > { %2156 = vst [vmem:[%s4167_s20 + $0x1c0] sm:$0xff] %v2092_v62  ;;  %v1907_v47 = vadd.f32 1.0, %v2818_v9 }
 0x34e   : > { %2157 = vst [vmem:[%s4167_s20 + $0x1c8] sm:$0xff] %v2093_v23 }
 0x34f   : > { %2829 = vrcp.f32 %v1907_v47 }
 0x350   : > { %v2820_v39 = vpop.eup %2819 }
 0x351   : > { %v2822_v7 = vpop.eup %2821  ;;  %v2094_v26 = vmul.f32 %v2820_v39, %v4575_v29 }
 0x352   : > { %v2095_v11 = vmul.f32 %v2822_v7, %v4585_v21 }
 0x353   : > { %v2824_v55 = vpop.eup %2823  ;;  %2158 = vst [vmem:[%s4167_s20 + $0x1d0] sm:$0xff] %v2094_v26 }
 0x354   : > { %v2826_v27 = vpop.eup %2825  ;;  %2159 = vst [vmem:[%s4167_s20 + $0x1d8] sm:$0xff] %v2095_v11  ;;  %v2096_v32 = vmul.f32 %v2824_v55, %v4589_v15 }
 0x355   : > { %v2828_v52 = vpop.eup %2827  ;;  %v2097_v16 = vmul.f32 %v2826_v27, %v4599_v50 }
 0x356   : > { %2160 = vst [vmem:[%s4167_s20 + $0x1e0] sm:$0xff] %v2096_v32  ;;  %v2098_v17 = vmul.f32 %v2828_v52, %v4603_v31 }
 0x357   : > { %2161 = vst [vmem:[%s4167_s20 + $0x1e8] sm:$0xff] %v2097_v16 }
 0x358   : > { %2162 = vst [vmem:[%s4167_s20 + $0x1f0] sm:$0xff] %v2098_v17 }
 0x359   : > { %v2830_v29 = vpop.eup %2829 }
 0x35a   : > { %v2099_v21 = vmul.f32 %v2830_v29, %v4611_v10 }
 0x35c   : > { %2163 = vst [vmem:[%s4167_s20 + $0x1f8] sm:$0xff] %v2099_v21 }
 0x35d   : > { %2930 = shalt.err (!%p2927_p2)
}
 0x35e   : > { %s2931_s10 = scalar_lea.hbm %s4644_s23, 8192  ;;  %s2935_s22 = scalar_lea.hbm %s4695_s3, 16384 }
 0x35f   : > { %p2932_p13 = scmp.ne.s32.totalorder %s4644_s23, %s2931_s10  ;;  %p2936_p4 = scmp.lt.u32.totalorder %s4644_s23, %s4695_s3 }
 0x360   : > { %p2937_p5 = scmp.lt.u32.totalorder %s2935_s22, %s2931_s10  ;;  %p2939_p11 = scmp.lt.u32.totalorder %s2931_s10, %s4644_s23 }
 0x361   : > { %p2933_p6 = pnand %p2932_p13, %p4949_p0 }
 0x362   : > { %p2938_p8 = por %p2937_p5, %p2936_p4 }
 0x363   : > { %p2934_p10 = pneg %p2933_p6 }
 0x364   : > { %p2940_p1 = por %p2939_p11, %p2938_p8 }
 0x366   : > { %p2941_p3 = pnand %p2940_p1, %p2934_p10 }
 0x368   : > { %2944 = shalt.err (!%p2941_p3)
}
 0x369   : > { %s2998_s18 = smov 256   ;;  %s2999_s20 = smov 16  }
 0x36a   : > { %2399 = dma.vmem_to_hbm [thread:$0]  (%p4949_p0), %s4646_s24, 8192, %s4644_s23, %s2165_s5, %s2998_s18, %s2998_s18, %s2999_s20  }
 0x36b PF: > { %s2194_s17 = sand.u32 1, %s2975_s12   ;;  %p4950_p7 = scmp.ne.s32.totalorder %s4762_s19, 0 }
 0x36c   : > { %p4951_p9 = scmp.ge.s32.totalorder %s2987_s15, 2  ;;  %s2195_s26 = scalar_lea.sflag [#allocation4], %s2194_s17 }
 0x36e   : > { %p2413_p12 = pnand %p4951_p9, %p4950_p7 }
 0x370   : > { %2970 = dma.done.wait (!%p2413_p12), %s2195_s26, 8192  }
 0x371   : > { %2972 = vsyncadd (!%p2413_p12), %s2195_s26, 4294959104  ;;  %p17_p2 = scmp.ge.s32.totalorder %s3130_s4, 4   ;;  %s4952_s12 = smov %s2979_s13 }
 0x372   : > { %s4953_s13 = smov %s2983_s14  ;;  %s4954_s14 = smov %s3146_s7 }
 0x373   : > { %s4955_s15 = smov %s3130_s4  ;;  %19 = sbr.rel (!%p17_p2) target bundleno = 6 (0x6), region = 87 }
 0x37a   :  { %2200 = vsyncpa [#allocation3], 1 }
 0x37b   :  { %2202 = vsyncpa [#allocation3 + $0x1], 1 }
 0x37c   :  { %2203 = vsyncpa [#allocation6], 1 }
 0x37d   :  { %2204 = vsyncpa [#allocation4], 1 }
 0x37e   :  { %2206 = vsyncpa [#allocation4 + $0x1], 1 }

</bundles_post_ra>
